<compile_context>
chip_gen: v6e
topology: v6e:2x2x1
jax: 0.10.0
libtpu: 0.0.40
codegen_flags: <defaults>
</compile_context>

<pallas_src>
import math

import jax
import jax.numpy as jnp
from jax.experimental import pallas as pl
from jax.experimental.pallas import tpu as pltpu

# ----------------------------- config -----------------------------
B, S, H = 2, 8, 32
NUM_HEADS = 4
HEAD_DIM = H // NUM_HEADS
INTERMEDIATE = 64
VOCAB, TYPE_VOCAB, MAX_POS = 100, 2, 16
NUM_LAYERS = 2
NUM_CLASS = 590
NUM_CLASS_PAD = 640          # pad fc out-dim to a multiple of 128 -> lane-dense store
LN_EPS = 1e-12
VEC_W = 3 * H                # lane width of the packed per-layer vector slab

# rows of the packed per-layer (L, 8, VEC_W) bias / LayerNorm slab
(_R_BQKV, _R_BO, _R_LN1G, _R_LN1B, _R_B1, _R_B2, _R_LN2G, _R_LN2B) = range(8)


# ------------------------- in-kernel helpers ------------------------
def _layernorm(z, g, b):
    mean = jnp.mean(z, axis=-1, keepdims=True)
    cen = z - mean
    var = jnp.mean(cen * cen, axis=-1, keepdims=True)
    return cen * jax.lax.rsqrt(var + LN_EPS) * g + b


def _gelu(x):
    # exact (erf) GELU, matching HF BERT's default "gelu"
    return 0.5 * x * (1.0 + jax.lax.erf(x * (1.0 / math.sqrt(2.0))))


# --------------------------- fused kernel ---------------------------
def _bert_fused_kernel(word_ref, tok_ref, pos_ref, mask_ref,
                       emb_g_ref, emb_b_ref,
                       wqkv_ref, wo_ref, w1_ref, w2_ref, lvec_ref,
                       fc_w_ref, fc_b_ref,
                       logits_ref,
                       hid_ref, fc_w_buf, fc_sem):
    l = pl.program_id(0)
    last = pl.num_programs(0) - 1

    # ---- step 0: three-way embedding add + LayerNorm into the hidden carry ----
    @pl.when(l == 0)
    def _():
        emb = word_ref[...] + tok_ref[...]                                   # (BS, H)
        emb = (emb.reshape(B, S, H) + pos_ref[...]).reshape(B * S, H)        # + (S, H) pos
        hid_ref[...] = _layernorm(emb, emb_g_ref[...], emb_b_ref[...])

    # ---- last step: kick off the classifier-weight DMA; overlaps with this layer ----
    @pl.when(l == last)
    def _():
        pltpu.make_async_copy(fc_w_ref, fc_w_buf, fc_sem).start()

    hid = hid_ref[...]                                                       # (BS, H) f32

    # packed per-layer bias / LayerNorm vectors: one DMA per step instead of eight
    vec = lvec_ref[0]                                                        # (8, 3H) f32
    bqkv = vec[_R_BQKV:_R_BQKV + 1, :]
    bo = vec[_R_BO:_R_BO + 1, :H]
    ln1_g = vec[_R_LN1G:_R_LN1G + 1, :H]
    ln1_b = vec[_R_LN1B:_R_LN1B + 1, :H]
    b1 = vec[_R_B1:_R_B1 + 1, :INTERMEDIATE]
    b2 = vec[_R_B2:_R_B2 + 1, :H]
    ln2_g = vec[_R_LN2G:_R_LN2G + 1, :H]
    ln2_b = vec[_R_LN2B:_R_LN2B + 1, :H]

    # ---- fused QKV projection: bf16 operands, f32 accumulation on the MXU ----
    qkv = jnp.dot(hid.astype(jnp.bfloat16), wqkv_ref[0],
                  preferred_element_type=jnp.float32) + bqkv                 # (BS, 3H) f32

    # ---- head-batched attention over ALL heads in one pair of einsums ----
    def gather_heads(col0):
        # (BS, H)-columns -> head-major (NUM_HEADS*B, S, dh); batch index = h*B + b
        parts = [qkv[:, col0 + h * HEAD_DIM: col0 + (h + 1) * HEAD_DIM]
                 .reshape(B, S, HEAD_DIM) for h in range(NUM_HEADS)]
        return jnp.concatenate(parts, axis=0)

    q = gather_heads(0).astype(jnp.bfloat16)                                 # (HB, S, dh)
    k = gather_heads(H).astype(jnp.bfloat16)
    v = gather_heads(2 * H).astype(jnp.bfloat16)

    scale = 1.0 / math.sqrt(HEAD_DIM)
    s = jnp.einsum('bqd,bkd->bqk', q, k,
                   preferred_element_type=jnp.float32)                       # (HB, S, S) f32
    s = s * scale + mask_ref[...]                                            # mask (HB, 1, S)
    m = jnp.max(s, axis=-1, keepdims=True)
    p = jnp.exp(s - m)
    p = p * pl.reciprocal(jnp.sum(p, axis=-1, keepdims=True), approx=True)
    ctx = jnp.einsum('bqk,bkd->bqd', p.astype(jnp.bfloat16), v,
                     preferred_element_type=jnp.float32)                     # (HB, S, dh) f32
    # merge heads back to (BS, H) and apply ONE fused output projection
    ctx = jnp.concatenate(
        [ctx[h * B:(h + 1) * B].reshape(B * S, HEAD_DIM) for h in range(NUM_HEADS)],
        axis=-1)                                                             # (BS, H) f32
    attn = jnp.dot(ctx.astype(jnp.bfloat16), wo_ref[0],
                   preferred_element_type=jnp.float32) + bo
    hid = _layernorm(attn + hid, ln1_g, ln1_b)                               # f32 residual/LN

    # ---- FFN (bf16 matmul operands, f32 elementwise/GELU) ----
    ffn = jnp.dot(hid.astype(jnp.bfloat16), w1_ref[0],
                  preferred_element_type=jnp.float32) + b1
    ffn = _gelu(ffn)
    ffn = jnp.dot(ffn.astype(jnp.bfloat16), w2_ref[0],
                  preferred_element_type=jnp.float32) + b2
    hid = _layernorm(ffn + hid, ln2_g, ln2_b)

    hid_ref[...] = hid                                                       # carry to next layer

    # ---- last step: CLS token -> dropout (identity in eval) -> fc (lane-dense 640) ----
    @pl.when(l == last)
    def _():
        pltpu.make_async_copy(fc_w_ref, fc_w_buf, fc_sem).wait()
        cls = hid.reshape(B, S, H)[:, 0, :]                                  # (B, H)
        # TODO(synk): training-mode dropout (p=0.5) via pltpu.prng_random_bits Bernoulli mask.
        logits = jnp.dot(cls.astype(jnp.bfloat16), fc_w_buf[...],
                         preferred_element_type=jnp.float32) + fc_b_ref[...]
        logits_ref[...] = logits.astype(logits_ref.dtype)


# ----------------------------- forward ------------------------------
def custom_bert_forward(params, input_ids, attention_mask, token_type_ids):
    # embedding gathers are plain-JAX glue; everything else is one fused pallas_call
    word = jnp.take(params["word_emb"], input_ids.reshape(-1), axis=0)       # (BS, H)
    tok = jnp.take(params["type_emb"], token_type_ids.reshape(-1), axis=0)   # (BS, H)
    pos = params["pos_emb"][:S]                                              # (S, H)
    # additive mask, pre-broadcast to the head-major (NUM_HEADS*B, 1, S) batch layout
    add_mask = ((1.0 - attention_mask.astype(jnp.float32)) * -10000.0).reshape(1, B, 1, S)
    add_mask = jnp.broadcast_to(add_mask, (NUM_HEADS, B, 1, S)).reshape(NUM_HEADS * B, 1, S)

    lsel = lambda l: (l, 0, 0)      # per-layer weight slab (streamed layer-by-layer)
    fix2 = lambda l: (0, 0)         # resident 2-D block
    fix3 = lambda l: (0, 0, 0)      # resident 3-D block

    logits = pl.pallas_call(
        _bert_fused_kernel,
        out_shape=jax.ShapeDtypeStruct((B, NUM_CLASS_PAD), jnp.float32),
        grid_spec=pltpu.PrefetchScalarGridSpec(
            num_scalar_prefetch=0,
            grid=(NUM_LAYERS,),
            in_specs=[
                pl.BlockSpec((B * S, H), fix2),                  # word embeddings
                pl.BlockSpec((B * S, H), fix2),                  # token-type embeddings
                pl.BlockSpec((S, H), fix2),                      # position embeddings
                pl.BlockSpec((NUM_HEADS * B, 1, S), fix3),       # additive mask (head-major)
                pl.BlockSpec((1, H), fix2),                      # emb LN gamma
                pl.BlockSpec((1, H), fix2),                      # emb LN beta
                pl.BlockSpec((1, H, 3 * H), lsel),               # wqkv (bf16, fused Q|K|V)
                pl.BlockSpec((1, H, H), lsel),                   # wo   (bf16)
                pl.BlockSpec((1, H, INTERMEDIATE), lsel),        # w1   (bf16)
                pl.BlockSpec((1, INTERMEDIATE, H), lsel),        # w2   (bf16)
                pl.BlockSpec((1, 8, VEC_W), lsel),               # packed per-layer vectors
                pl.BlockSpec(memory_space=pl.ANY),               # fc_w (bf16, stays in HBM)
                pl.BlockSpec((1, NUM_CLASS_PAD), fix2),          # fc_b (zero-padded)
            ],
            out_specs=pl.BlockSpec((B, NUM_CLASS_PAD), fix2),
            scratch_shapes=[
                pltpu.VMEM((B * S, H), jnp.float32),             # hidden-state carry (f32)
                pltpu.VMEM((H, NUM_CLASS_PAD), jnp.bfloat16),    # fc weight landing buffer
                pltpu.SemaphoreType.DMA(()),                     # fc weight DMA semaphore
            ]),
        compiler_params=pltpu.CompilerParams(
            dimension_semantics=("arbitrary",),       # layers are a sequential carry
            # explicit VMEM budget; raise per generation at real size (v7x: 64 MiB physical)
            vmem_limit_bytes=32 * 1024 * 1024),
    )(word, tok, pos, add_mask,
      params["emb_ln_g"], params["emb_ln_b"],
      params["wqkv"], params["wo"], params["w1"], params["w2"], params["layer_vec"],
      params["fc_w"], params["fc_b"])
    return logits[:, :NUM_CLASS]


# --------------------------- parameters -----------------------------
def _pack_layer_vectors(bqkv, bo, ln1_g, ln1_b, b1, b2, ln2_g, ln2_b):
    # pack the 8 small per-layer vectors into one (L, 8, 3H) slab (zero-padded lanes)
    def row(x):
        return jnp.pad(x, ((0, 0), (0, VEC_W - x.shape[-1])))[:, None, :]
    return jnp.concatenate([row(bqkv), row(bo), row(ln1_g), row(ln1_b),
                            row(b1), row(b2), row(ln2_g), row(ln2_b)],
                           axis=1).astype(jnp.float32)


def init_params(key):
    keys = iter(jax.random.split(key, 8))

    def nrm(shape, std=0.02):
        return (std * jax.random.normal(next(keys), shape)).astype(jnp.float32)

    zeros = lambda w: jnp.zeros((NUM_LAYERS, w), jnp.float32)
    ones = lambda w: jnp.ones((NUM_LAYERS, w), jnp.float32)

    params = {
        "word_emb": nrm((VOCAB, H)),
        "pos_emb": nrm((MAX_POS, H)),
        "type_emb": nrm((TYPE_VOCAB, H)),
        "emb_ln_g": jnp.ones((1, H), jnp.float32),
        "emb_ln_b": jnp.zeros((1, H), jnp.float32),
        # per-layer matmul weights stacked on a leading layer axis, stored bf16 in HBM
        "wqkv": nrm((NUM_LAYERS, H, 3 * H)).astype(jnp.bfloat16),
        "wo": nrm((NUM_LAYERS, H, H)).astype(jnp.bfloat16),
        "w1": nrm((NUM_LAYERS, H, INTERMEDIATE)).astype(jnp.bfloat16),
        "w2": nrm((NUM_LAYERS, INTERMEDIATE, H)).astype(jnp.bfloat16),
        # the 8 tiny per-layer bias / LayerNorm vectors packed into one DMA-able slab
        "layer_vec": _pack_layer_vectors(
            bqkv=zeros(3 * H), bo=zeros(H), ln1_g=ones(H), ln1_b=zeros(H),
            b1=zeros(INTERMEDIATE), b2=zeros(H), ln2_g=ones(H), ln2_b=zeros(H)),
    }
    # classifier head: Linear(H, NUM_CLASS), zero-padded to NUM_CLASS_PAD columns, bf16
    fc_w = nrm((H, NUM_CLASS))
    params["fc_w"] = jnp.pad(
        fc_w, ((0, 0), (0, NUM_CLASS_PAD - NUM_CLASS))).astype(jnp.bfloat16)
    params["fc_b"] = jnp.zeros((1, NUM_CLASS_PAD), jnp.float32)
    return params


# ------------------------------- main -------------------------------
if __name__ == "__main__":
    key = jax.random.PRNGKey(0)
    pkey, dkey = jax.random.split(key)

    params = init_params(pkey)

    input_ids = jax.random.randint(dkey, (B, S), 0, VOCAB, dtype=jnp.int32)
    attention_mask = jnp.ones((B, S), dtype=jnp.int32).at[1, S - 2:].set(0)  # some padding
    token_type_ids = jnp.zeros((B, S), dtype=jnp.int32)

    fwd = jax.jit(custom_bert_forward)
    logits = fwd(params, input_ids, attention_mask, token_type_ids)
    jax.block_until_ready(logits)

    assert logits.shape == (B, NUM_CLASS), logits.shape
    assert bool(jnp.all(jnp.isfinite(logits)))
    print("KERNEL_OK")
</pallas_src>

<mosaic_0001>
module attributes {stable_mosaic.version = 11 : i64} {
  func.func @_bert_fused_kernel(%arg0: i32, %arg1: memref<16x32xf32, #tpu.memory_space<vmem>>, %arg2: memref<16x32xf32, #tpu.memory_space<vmem>>, %arg3: memref<8x32xf32, #tpu.memory_space<vmem>>, %arg4: memref<8x1x8xf32, #tpu.memory_space<vmem>>, %arg5: memref<1x32xf32, #tpu.memory_space<vmem>>, %arg6: memref<1x32xf32, #tpu.memory_space<vmem>>, %arg7: memref<1x32x96xbf16, #tpu.memory_space<vmem>>, %arg8: memref<1x32x32xbf16, #tpu.memory_space<vmem>>, %arg9: memref<1x32x64xbf16, #tpu.memory_space<vmem>>, %arg10: memref<1x64x32xbf16, #tpu.memory_space<vmem>>, %arg11: memref<1x8x96xf32, #tpu.memory_space<vmem>>, %arg12: memref<32x640xbf16, #tpu.memory_space<any>>, %arg13: memref<1x640xf32, #tpu.memory_space<vmem>>, %arg14: memref<2x640xf32, #tpu.memory_space<vmem>>, %arg15: memref<16x32xf32, #tpu.memory_space<vmem>>, %arg16: memref<32x640xbf16, #tpu.memory_space<vmem>>, %arg17: memref<!tpu.dma_semaphore, #tpu.memory_space<semaphore_mem>>) attributes {dimension_semantics = [#tpu.dimension_semantics<arbitrary>], iteration_bounds = array<i64: 2>, scalar_prefetch = 0 : i64, scratch_operands = 3 : i64, tpu.core_type = #tpu.core_type<tc>, window_params = [{pipeline_mode = #tpu.pipeline_mode<synchronous>, transform_indices = @transform_0, window_bounds = array<i64: 16, 32>}, {pipeline_mode = #tpu.pipeline_mode<synchronous>, transform_indices = @transform_1, window_bounds = array<i64: 16, 32>}, {pipeline_mode = #tpu.pipeline_mode<synchronous>, transform_indices = @transform_2, window_bounds = array<i64: 8, 32>}, {pipeline_mode = #tpu.pipeline_mode<synchronous>, transform_indices = @transform_3, window_bounds = array<i64: 8, 1, 8>}, {pipeline_mode = #tpu.pipeline_mode<synchronous>, transform_indices = @transform_4, window_bounds = array<i64: 1, 32>}, {pipeline_mode = #tpu.pipeline_mode<synchronous>, transform_indices = @transform_5, window_bounds = array<i64: 1, 32>}, {transform_indices = @transform_6, window_bounds = array<i64: 1, 32, 96>}, {transform_indices = @transform_7, window_bounds = array<i64: 1, 32, 32>}, {transform_indices = @transform_8, window_bounds = array<i64: 1, 32, 64>}, {transform_indices = @transform_9, window_bounds = array<i64: 1, 64, 32>}, {transform_indices = @transform_10, window_bounds = array<i64: 1, 8, 96>}, {}, {pipeline_mode = #tpu.pipeline_mode<synchronous>, transform_indices = @transform_12, window_bounds = array<i64: 1, 640>}, {pipeline_mode = #tpu.pipeline_mode<synchronous>, transform_indices = @transform_13, window_bounds = array<i64: 2, 640>}]} {
    %c0_i32 = arith.constant 0 : i32
    %0 = arith.cmpi eq, %arg0, %c0_i32 : i32
    %1 = arith.extui %0 : i1 to i32
    %c0_i32_0 = arith.constant 0 : i32
    %2 = arith.cmpi ne, %1, %c0_i32_0 : i32
    scf.if %2 {
      %c0_46 = arith.constant 0 : index
      %c0_47 = arith.constant 0 : index
      %152 = vector.load %arg1[%c0_46, %c0_47] : memref<16x32xf32, #tpu.memory_space<vmem>>, vector<16x32xf32>
      %c0_48 = arith.constant 0 : index
      %c0_49 = arith.constant 0 : index
      %153 = vector.load %arg2[%c0_48, %c0_49] : memref<16x32xf32, #tpu.memory_space<vmem>>, vector<16x32xf32>
      %154 = arith.addf %152, %153 : vector<16x32xf32>
      %155 = vector.shape_cast %154 : vector<16x32xf32> to vector<2x8x32xf32>
      %c0_50 = arith.constant 0 : index
      %c0_51 = arith.constant 0 : index
      %156 = vector.load %arg3[%c0_50, %c0_51] : memref<8x32xf32, #tpu.memory_space<vmem>>, vector<8x32xf32>
      %157 = vector.shape_cast %156 : vector<8x32xf32> to vector<1x8x32xf32>
      %158 = vector.broadcast %157 : vector<1x8x32xf32> to vector<2x8x32xf32>
      %159 = arith.addf %155, %158 : vector<2x8x32xf32>
      %160 = vector.shape_cast %159 : vector<2x8x32xf32> to vector<16x32xf32>
      %c0_52 = arith.constant 0 : index
      %c0_53 = arith.constant 0 : index
      %161 = vector.load %arg5[%c0_52, %c0_53] : memref<1x32xf32, #tpu.memory_space<vmem>>, vector<1x32xf32>
      %c0_54 = arith.constant 0 : index
      %c0_55 = arith.constant 0 : index
      %162 = vector.load %arg6[%c0_54, %c0_55] : memref<1x32xf32, #tpu.memory_space<vmem>>, vector<1x32xf32>
      %cst_56 = arith.constant dense<0.000000e+00> : vector<16xf32>
      %163 = vector.multi_reduction <add>, %160, %cst_56 [1] : vector<16x32xf32> to vector<16xf32>
      %164 = vector.shape_cast %163 : vector<16xf32> to vector<16x1xf32>
      %cst_57 = arith.constant 3.200000e+01 : f32
      %165 = vector.broadcast %cst_57 : f32 to vector<16x1xf32>
      %166 = arith.divf %164, %165 : vector<16x1xf32>
      %167 = vector.broadcast %166 : vector<16x1xf32> to vector<16x32xf32>
      %168 = arith.subf %160, %167 : vector<16x32xf32>
      %169 = arith.mulf %168, %168 : vector<16x32xf32>
      %cst_58 = arith.constant dense<0.000000e+00> : vector<16xf32>
      %170 = vector.multi_reduction <add>, %169, %cst_58 [1] : vector<16x32xf32> to vector<16xf32>
      %171 = vector.shape_cast %170 : vector<16xf32> to vector<16x1xf32>
      %cst_59 = arith.constant 3.200000e+01 : f32
      %172 = vector.broadcast %cst_59 : f32 to vector<16x1xf32>
      %173 = arith.divf %171, %172 : vector<16x1xf32>
      %cst_60 = arith.constant 9.99999996E-13 : f32
      %174 = vector.broadcast %cst_60 : f32 to vector<16x1xf32>
      %175 = arith.addf %173, %174 : vector<16x1xf32>
      %176 = math.rsqrt %175 : vector<16x1xf32>
      %177 = vector.broadcast %176 : vector<16x1xf32> to vector<16x32xf32>
      %178 = arith.mulf %168, %177 : vector<16x32xf32>
      %179 = vector.broadcast %161 : vector<1x32xf32> to vector<16x32xf32>
      %180 = arith.mulf %178, %179 : vector<16x32xf32>
      %181 = vector.broadcast %162 : vector<1x32xf32> to vector<16x32xf32>
      %182 = arith.addf %180, %181 : vector<16x32xf32>
      %c0_61 = arith.constant 0 : index
      %c0_62 = arith.constant 0 : index
      %183 = vector.load %arg15[%c0_61, %c0_62] : memref<16x32xf32, #tpu.memory_space<vmem>>, vector<16x32xf32>
      tpu.vector_store %arg15[%c0_61, %c0_62], %182 {strides = array<i32>} : memref<16x32xf32, #tpu.memory_space<vmem>>, vector<16x32xf32>,
    } else {
    }
    %c1_i32 = arith.constant 1 : i32
    %3 = arith.cmpi eq, %arg0, %c1_i32 : i32
    %4 = arith.extui %3 : i1 to i32
    %c0_i32_1 = arith.constant 0 : i32
    %5 = arith.cmpi ne, %4, %c0_i32_1 : i32
    scf.if %5 {
      tpu.enqueue_dma source(%arg12 : memref<32x640xbf16, #tpu.memory_space<any>>) target(%arg16 : memref<32x640xbf16, #tpu.memory_space<vmem>>) target_semaphore(%arg17 : memref<!tpu.dma_semaphore, #tpu.memory_space<semaphore_mem>>)
    } else {
    }
    %c0 = arith.constant 0 : index
    %c0_2 = arith.constant 0 : index
    %6 = vector.load %arg15[%c0, %c0_2] : memref<16x32xf32, #tpu.memory_space<vmem>>, vector<16x32xf32>
    %c0_3 = arith.constant 0 : index
    %c0_4 = arith.constant 0 : index
    %c0_5 = arith.constant 0 : index
    %7 = vector.load %arg11[%c0_3, %c0_4, %c0_5] : memref<1x8x96xf32, #tpu.memory_space<vmem>>, vector<1x8x96xf32>
    %8 = vector.shape_cast %7 : vector<1x8x96xf32> to vector<8x96xf32>
    %9 = vector.extract_strided_slice %8 {offsets = [0, 0], sizes = [1, 96], strides = [1, 1]} : vector<8x96xf32> to vector<1x96xf32>
    %10 = vector.extract_strided_slice %8 {offsets = [1, 0], sizes = [1, 32], strides = [1, 1]} : vector<8x96xf32> to vector<1x32xf32>
    %11 = vector.extract_strided_slice %8 {offsets = [2, 0], sizes = [1, 32], strides = [1, 1]} : vector<8x96xf32> to vector<1x32xf32>
    %12 = vector.extract_strided_slice %8 {offsets = [3, 0], sizes = [1, 32], strides = [1, 1]} : vector<8x96xf32> to vector<1x32xf32>
    %13 = vector.extract_strided_slice %8 {offsets = [4, 0], sizes = [1, 64], strides = [1, 1]} : vector<8x96xf32> to vector<1x64xf32>
    %14 = vector.extract_strided_slice %8 {offsets = [5, 0], sizes = [1, 32], strides = [1, 1]} : vector<8x96xf32> to vector<1x32xf32>
    %15 = vector.extract_strided_slice %8 {offsets = [6, 0], sizes = [1, 32], strides = [1, 1]} : vector<8x96xf32> to vector<1x32xf32>
    %16 = vector.extract_strided_slice %8 {offsets = [7, 0], sizes = [1, 32], strides = [1, 1]} : vector<8x96xf32> to vector<1x32xf32>
    %17 = arith.truncf %6 : vector<16x32xf32> to vector<16x32xbf16>
    %c0_6 = arith.constant 0 : index
    %c0_7 = arith.constant 0 : index
    %c0_8 = arith.constant 0 : index
    %18 = vector.load %arg7[%c0_6, %c0_7, %c0_8] : memref<1x32x96xbf16, #tpu.memory_space<vmem>>, vector<1x32x96xbf16>
    %19 = vector.shape_cast %18 : vector<1x32x96xbf16> to vector<32x96xbf16>
    %cst = arith.constant dense<0.000000e+00> : vector<16x96xf32>
    %20 = tpu.matmul %17, %19, %cst {dimension_numbers = #tpu.dot_dimension_numbers<[1], [0], [0], [1], [0, 0, 1, 1], [], []>} : vector<16x32xbf16>, vector<32x96xbf16>, vector<16x96xf32> -> vector<16x96xf32>
    %21 = vector.broadcast %9 : vector<1x96xf32> to vector<16x96xf32>
    %22 = arith.addf %20, %21 : vector<16x96xf32>
    %23 = vector.extract_strided_slice %22 {offsets = [0, 0], sizes = [16, 8], strides = [1, 1]} : vector<16x96xf32> to vector<16x8xf32>
    %24 = vector.shape_cast %23 : vector<16x8xf32> to vector<2x8x8xf32>
    %25 = vector.extract_strided_slice %22 {offsets = [0, 8], sizes = [16, 8], strides = [1, 1]} : vector<16x96xf32> to vector<16x8xf32>
    %26 = vector.shape_cast %25 : vector<16x8xf32> to vector<2x8x8xf32>
    %27 = vector.extract_strided_slice %22 {offsets = [0, 16], sizes = [16, 8], strides = [1, 1]} : vector<16x96xf32> to vector<16x8xf32>
    %28 = vector.shape_cast %27 : vector<16x8xf32> to vector<2x8x8xf32>
    %29 = vector.extract_strided_slice %22 {offsets = [0, 24], sizes = [16, 8], strides = [1, 1]} : vector<16x96xf32> to vector<16x8xf32>
    %30 = vector.shape_cast %29 : vector<16x8xf32> to vector<2x8x8xf32>
    %31 = tpu.concatenate %24, %26, %28, %30 in 0 : vector<2x8x8xf32>, vector<2x8x8xf32>, vector<2x8x8xf32>, vector<2x8x8xf32> -> vector<8x8x8xf32>
    %32 = arith.truncf %31 : vector<8x8x8xf32> to vector<8x8x8xbf16>
    %33 = vector.extract_strided_slice %22 {offsets = [0, 32], sizes = [16, 8], strides = [1, 1]} : vector<16x96xf32> to vector<16x8xf32>
    %34 = vector.shape_cast %33 : vector<16x8xf32> to vector<2x8x8xf32>
    %35 = vector.extract_strided_slice %22 {offsets = [0, 40], sizes = [16, 8], strides = [1, 1]} : vector<16x96xf32> to vector<16x8xf32>
    %36 = vector.shape_cast %35 : vector<16x8xf32> to vector<2x8x8xf32>
    %37 = vector.extract_strided_slice %22 {offsets = [0, 48], sizes = [16, 8], strides = [1, 1]} : vector<16x96xf32> to vector<16x8xf32>
    %38 = vector.shape_cast %37 : vector<16x8xf32> to vector<2x8x8xf32>
    %39 = vector.extract_strided_slice %22 {offsets = [0, 56], sizes = [16, 8], strides = [1, 1]} : vector<16x96xf32> to vector<16x8xf32>
    %40 = vector.shape_cast %39 : vector<16x8xf32> to vector<2x8x8xf32>
    %41 = tpu.concatenate %34, %36, %38, %40 in 0 : vector<2x8x8xf32>, vector<2x8x8xf32>, vector<2x8x8xf32>, vector<2x8x8xf32> -> vector<8x8x8xf32>
    %42 = arith.truncf %41 : vector<8x8x8xf32> to vector<8x8x8xbf16>
    %43 = vector.extract_strided_slice %22 {offsets = [0, 64], sizes = [16, 8], strides = [1, 1]} : vector<16x96xf32> to vector<16x8xf32>
    %44 = vector.shape_cast %43 : vector<16x8xf32> to vector<2x8x8xf32>
    %45 = vector.extract_strided_slice %22 {offsets = [0, 72], sizes = [16, 8], strides = [1, 1]} : vector<16x96xf32> to vector<16x8xf32>
    %46 = vector.shape_cast %45 : vector<16x8xf32> to vector<2x8x8xf32>
    %47 = vector.extract_strided_slice %22 {offsets = [0, 80], sizes = [16, 8], strides = [1, 1]} : vector<16x96xf32> to vector<16x8xf32>
    %48 = vector.shape_cast %47 : vector<16x8xf32> to vector<2x8x8xf32>
    %49 = vector.extract_strided_slice %22 {offsets = [0, 88], sizes = [16, 8], strides = [1, 1]} : vector<16x96xf32> to vector<16x8xf32>
    %50 = vector.shape_cast %49 : vector<16x8xf32> to vector<2x8x8xf32>
    %51 = tpu.concatenate %44, %46, %48, %50 in 0 : vector<2x8x8xf32>, vector<2x8x8xf32>, vector<2x8x8xf32>, vector<2x8x8xf32> -> vector<8x8x8xf32>
    %52 = arith.truncf %51 : vector<8x8x8xf32> to vector<8x8x8xbf16>
    "tpu.trace_start"() <{level = 10 : i32, message = "bqd,bkd->bqk"}> : () -> ()
    %cst_9 = arith.constant dense<0.000000e+00> : vector<8x8x8xf32>
    %53 = tpu.matmul %32, %42, %cst_9 {dimension_numbers = #tpu.dot_dimension_numbers<[2], [2], [1], [1], [0, 0, 0, 1, 1, 1], [0], [0]>} : vector<8x8x8xbf16>, vector<8x8x8xbf16>, vector<8x8x8xf32> -> vector<8x8x8xf32>
    "tpu.trace_stop"() : () -> ()
    %cst_10 = arith.constant 0.353553385 : f32
    %54 = vector.broadcast %cst_10 : f32 to vector<8x8x8xf32>
    %55 = arith.mulf %53, %54 : vector<8x8x8xf32>
    %c0_11 = arith.constant 0 : index
    %c0_12 = arith.constant 0 : index
    %c0_13 = arith.constant 0 : index
    %56 = vector.load %arg4[%c0_11, %c0_12, %c0_13] : memref<8x1x8xf32, #tpu.memory_space<vmem>>, vector<8x1x8xf32>
    %57 = vector.broadcast %56 : vector<8x1x8xf32> to vector<8x8x8xf32>
    %58 = arith.addf %55, %57 : vector<8x8x8xf32>
    %cst_14 = arith.constant dense<0xFF800000> : vector<8x8xf32>
    %59 = vector.multi_reduction <maximumf>, %58, %cst_14 [2] : vector<8x8x8xf32> to vector<8x8xf32>
    %60 = vector.shape_cast %59 : vector<8x8xf32> to vector<8x8x1xf32>
    %61 = vector.broadcast %60 : vector<8x8x1xf32> to vector<8x8x8xf32>
    %62 = arith.subf %58, %61 : vector<8x8x8xf32>
    %63 = math.exp %62 : vector<8x8x8xf32>
    %cst_15 = arith.constant dense<0.000000e+00> : vector<8x8xf32>
    %64 = vector.multi_reduction <add>, %63, %cst_15 [2] : vector<8x8x8xf32> to vector<8x8xf32>
    %65 = vector.shape_cast %64 : vector<8x8xf32> to vector<8x8x1xf32>
    %66 = tpu.reciprocal %65 {approx = true} : vector<8x8x1xf32> -> vector<8x8x1xf32>
    %67 = vector.broadcast %66 : vector<8x8x1xf32> to vector<8x8x8xf32>
    %68 = arith.mulf %63, %67 : vector<8x8x8xf32>
    %69 = arith.truncf %68 : vector<8x8x8xf32> to vector<8x8x8xbf16>
    "tpu.trace_start"() <{level = 10 : i32, message = "bqk,bkd->bqd"}> : () -> ()
    %cst_16 = arith.constant dense<0.000000e+00> : vector<8x8x8xf32>
    %70 = tpu.matmul %69, %52, %cst_16 {dimension_numbers = #tpu.dot_dimension_numbers<[2], [1], [1], [2], [0, 0, 0, 1, 1, 2], [0], [0]>} : vector<8x8x8xbf16>, vector<8x8x8xbf16>, vector<8x8x8xf32> -> vector<8x8x8xf32>
    "tpu.trace_stop"() : () -> ()
    %71 = vector.extract_strided_slice %70 {offsets = [0, 0, 0], sizes = [2, 8, 8], strides = [1, 1, 1]} : vector<8x8x8xf32> to vector<2x8x8xf32>
    %72 = vector.shape_cast %71 : vector<2x8x8xf32> to vector<16x8xf32>
    %73 = vector.extract_strided_slice %70 {offsets = [2, 0, 0], sizes = [2, 8, 8], strides = [1, 1, 1]} : vector<8x8x8xf32> to vector<2x8x8xf32>
    %74 = vector.shape_cast %73 : vector<2x8x8xf32> to vector<16x8xf32>
    %75 = vector.extract_strided_slice %70 {offsets = [4, 0, 0], sizes = [2, 8, 8], strides = [1, 1, 1]} : vector<8x8x8xf32> to vector<2x8x8xf32>
    %76 = vector.shape_cast %75 : vector<2x8x8xf32> to vector<16x8xf32>
    %77 = vector.extract_strided_slice %70 {offsets = [6, 0, 0], sizes = [2, 8, 8], strides = [1, 1, 1]} : vector<8x8x8xf32> to vector<2x8x8xf32>
    %78 = vector.shape_cast %77 : vector<2x8x8xf32> to vector<16x8xf32>
    %79 = tpu.concatenate %72, %74, %76, %78 in 1 : vector<16x8xf32>, vector<16x8xf32>, vector<16x8xf32>, vector<16x8xf32> -> vector<16x32xf32>
    %80 = arith.truncf %79 : vector<16x32xf32> to vector<16x32xbf16>
    %c0_17 = arith.constant 0 : index
    %c0_18 = arith.constant 0 : index
    %c0_19 = arith.constant 0 : index
    %81 = vector.load %arg8[%c0_17, %c0_18, %c0_19] : memref<1x32x32xbf16, #tpu.memory_space<vmem>>, vector<1x32x32xbf16>
    %82 = vector.shape_cast %81 : vector<1x32x32xbf16> to vector<32x32xbf16>
    %cst_20 = arith.constant dense<0.000000e+00> : vector<16x32xf32>
    %83 = tpu.matmul %80, %82, %cst_20 {dimension_numbers = #tpu.dot_dimension_numbers<[1], [0], [0], [1], [0, 0, 1, 1], [], []>} : vector<16x32xbf16>, vector<32x32xbf16>, vector<16x32xf32> -> vector<16x32xf32>
    %84 = vector.broadcast %10 : vector<1x32xf32> to vector<16x32xf32>
    %85 = arith.addf %83, %84 : vector<16x32xf32>
    %86 = arith.addf %85, %6 : vector<16x32xf32>
    %cst_21 = arith.constant dense<0.000000e+00> : vector<16xf32>
    %87 = vector.multi_reduction <add>, %86, %cst_21 [1] : vector<16x32xf32> to vector<16xf32>
    %88 = vector.shape_cast %87 : vector<16xf32> to vector<16x1xf32>
    %cst_22 = arith.constant 3.200000e+01 : f32
    %89 = vector.broadcast %cst_22 : f32 to vector<16x1xf32>
    %90 = arith.divf %88, %89 : vector<16x1xf32>
    %91 = vector.broadcast %90 : vector<16x1xf32> to vector<16x32xf32>
    %92 = arith.subf %86, %91 : vector<16x32xf32>
    %93 = arith.mulf %92, %92 : vector<16x32xf32>
    %cst_23 = arith.constant dense<0.000000e+00> : vector<16xf32>
    %94 = vector.multi_reduction <add>, %93, %cst_23 [1] : vector<16x32xf32> to vector<16xf32>
    %95 = vector.shape_cast %94 : vector<16xf32> to vector<16x1xf32>
    %cst_24 = arith.constant 3.200000e+01 : f32
    %96 = vector.broadcast %cst_24 : f32 to vector<16x1xf32>
    %97 = arith.divf %95, %96 : vector<16x1xf32>
    %cst_25 = arith.constant 9.99999996E-13 : f32
    %98 = vector.broadcast %cst_25 : f32 to vector<16x1xf32>
    %99 = arith.addf %97, %98 : vector<16x1xf32>
    %100 = math.rsqrt %99 : vector<16x1xf32>
    %101 = vector.broadcast %100 : vector<16x1xf32> to vector<16x32xf32>
    %102 = arith.mulf %92, %101 : vector<16x32xf32>
    %103 = vector.broadcast %11 : vector<1x32xf32> to vector<16x32xf32>
    %104 = arith.mulf %102, %103 : vector<16x32xf32>
    %105 = vector.broadcast %12 : vector<1x32xf32> to vector<16x32xf32>
    %106 = arith.addf %104, %105 : vector<16x32xf32>
    %107 = arith.truncf %106 : vector<16x32xf32> to vector<16x32xbf16>
    %c0_26 = arith.constant 0 : index
    %c0_27 = arith.constant 0 : index
    %c0_28 = arith.constant 0 : index
    %108 = vector.load %arg9[%c0_26, %c0_27, %c0_28] : memref<1x32x64xbf16, #tpu.memory_space<vmem>>, vector<1x32x64xbf16>
    %109 = vector.shape_cast %108 : vector<1x32x64xbf16> to vector<32x64xbf16>
    %cst_29 = arith.constant dense<0.000000e+00> : vector<16x64xf32>
    %110 = tpu.matmul %107, %109, %cst_29 {dimension_numbers = #tpu.dot_dimension_numbers<[1], [0], [0], [1], [0, 0, 1, 1], [], []>} : vector<16x32xbf16>, vector<32x64xbf16>, vector<16x64xf32> -> vector<16x64xf32>
    %111 = vector.broadcast %13 : vector<1x64xf32> to vector<16x64xf32>
    %112 = arith.addf %110, %111 : vector<16x64xf32>
    %cst_30 = arith.constant 5.000000e-01 : f32
    %113 = vector.broadcast %cst_30 : f32 to vector<16x64xf32>
    %114 = arith.mulf %113, %112 : vector<16x64xf32>
    %cst_31 = arith.constant 0.707106769 : f32
    %115 = vector.broadcast %cst_31 : f32 to vector<16x64xf32>
    %116 = arith.mulf %112, %115 : vector<16x64xf32>
    %117 = math.erf %116 : vector<16x64xf32>
    %cst_32 = arith.constant 1.000000e+00 : f32
    %118 = vector.broadcast %cst_32 : f32 to vector<16x64xf32>
    %119 = arith.addf %118, %117 : vector<16x64xf32>
    %120 = arith.mulf %114, %119 : vector<16x64xf32>
    %121 = arith.truncf %120 : vector<16x64xf32> to vector<16x64xbf16>
    %c0_33 = arith.constant 0 : index
    %c0_34 = arith.constant 0 : index
    %c0_35 = arith.constant 0 : index
    %122 = vector.load %arg10[%c0_33, %c0_34, %c0_35] : memref<1x64x32xbf16, #tpu.memory_space<vmem>>, vector<1x64x32xbf16>
    %123 = vector.shape_cast %122 : vector<1x64x32xbf16> to vector<64x32xbf16>
    %cst_36 = arith.constant dense<0.000000e+00> : vector<16x32xf32>
    %124 = tpu.matmul %121, %123, %cst_36 {dimension_numbers = #tpu.dot_dimension_numbers<[1], [0], [0], [1], [0, 0, 1, 1], [], []>} : vector<16x64xbf16>, vector<64x32xbf16>, vector<16x32xf32> -> vector<16x32xf32>
    %125 = vector.broadcast %14 : vector<1x32xf32> to vector<16x32xf32>
    %126 = arith.addf %124, %125 : vector<16x32xf32>
    %127 = arith.addf %126, %106 : vector<16x32xf32>
    %cst_37 = arith.constant dense<0.000000e+00> : vector<16xf32>
    %128 = vector.multi_reduction <add>, %127, %cst_37 [1] : vector<16x32xf32> to vector<16xf32>
    %129 = vector.shape_cast %128 : vector<16xf32> to vector<16x1xf32>
    %cst_38 = arith.constant 3.200000e+01 : f32
    %130 = vector.broadcast %cst_38 : f32 to vector<16x1xf32>
    %131 = arith.divf %129, %130 : vector<16x1xf32>
    %132 = vector.broadcast %131 : vector<16x1xf32> to vector<16x32xf32>
    %133 = arith.subf %127, %132 : vector<16x32xf32>
    %134 = arith.mulf %133, %133 : vector<16x32xf32>
    %cst_39 = arith.constant dense<0.000000e+00> : vector<16xf32>
    %135 = vector.multi_reduction <add>, %134, %cst_39 [1] : vector<16x32xf32> to vector<16xf32>
    %136 = vector.shape_cast %135 : vector<16xf32> to vector<16x1xf32>
    %cst_40 = arith.constant 3.200000e+01 : f32
    %137 = vector.broadcast %cst_40 : f32 to vector<16x1xf32>
    %138 = arith.divf %136, %137 : vector<16x1xf32>
    %cst_41 = arith.constant 9.99999996E-13 : f32
    %139 = vector.broadcast %cst_41 : f32 to vector<16x1xf32>
    %140 = arith.addf %138, %139 : vector<16x1xf32>
    %141 = math.rsqrt %140 : vector<16x1xf32>
    %142 = vector.broadcast %141 : vector<16x1xf32> to vector<16x32xf32>
    %143 = arith.mulf %133, %142 : vector<16x32xf32>
    %144 = vector.broadcast %15 : vector<1x32xf32> to vector<16x32xf32>
    %145 = arith.mulf %143, %144 : vector<16x32xf32>
    %146 = vector.broadcast %16 : vector<1x32xf32> to vector<16x32xf32>
    %147 = arith.addf %145, %146 : vector<16x32xf32>
    %c0_42 = arith.constant 0 : index
    %c0_43 = arith.constant 0 : index
    %148 = vector.load %arg15[%c0_42, %c0_43] : memref<16x32xf32, #tpu.memory_space<vmem>>, vector<16x32xf32>
    tpu.vector_store %arg15[%c0_42, %c0_43], %147 {strides = array<i32>} : memref<16x32xf32, #tpu.memory_space<vmem>>, vector<16x32xf32>,
    %c1_i32_44 = arith.constant 1 : i32
    %149 = arith.cmpi eq, %arg0, %c1_i32_44 : i32
    %150 = arith.extui %149 : i1 to i32
    %c0_i32_45 = arith.constant 0 : i32
    %151 = arith.cmpi ne, %150, %c0_i32_45 : i32
    scf.if %151 {
      tpu.wait_dma2 semaphore(%arg17 : memref<!tpu.dma_semaphore, #tpu.memory_space<semaphore_mem>>) src(%arg12 : memref<32x640xbf16, #tpu.memory_space<any>>) dst(%arg16 : memref<32x640xbf16, #tpu.memory_space<vmem>>)
      %152 = vector.shape_cast %147 : vector<16x32xf32> to vector<2x8x32xf32>
      %153 = vector.extract_strided_slice %152 {offsets = [0, 0, 0], sizes = [2, 1, 32], strides = [1, 1, 1]} : vector<2x8x32xf32> to vector<2x1x32xf32>
      %154 = vector.shape_cast %153 : vector<2x1x32xf32> to vector<2x32xf32>
      %155 = arith.truncf %154 : vector<2x32xf32> to vector<2x32xbf16>
      %c0_46 = arith.constant 0 : index
      %c0_47 = arith.constant 0 : index
      %156 = vector.load %arg16[%c0_46, %c0_47] : memref<32x640xbf16, #tpu.memory_space<vmem>>, vector<32x640xbf16>
      %cst_48 = arith.constant dense<0.000000e+00> : vector<2x640xf32>
      %157 = tpu.matmul %155, %156, %cst_48 {dimension_numbers = #tpu.dot_dimension_numbers<[1], [0], [0], [1], [0, 0, 1, 1], [], []>} : vector<2x32xbf16>, vector<32x640xbf16>, vector<2x640xf32> -> vector<2x640xf32>
      %c0_49 = arith.constant 0 : index
      %c0_50 = arith.constant 0 : index
      %158 = vector.load %arg13[%c0_49, %c0_50] : memref<1x640xf32, #tpu.memory_space<vmem>>, vector<1x640xf32>
      %159 = vector.broadcast %158 : vector<1x640xf32> to vector<2x640xf32>
      %160 = arith.addf %157, %159 : vector<2x640xf32>
      %c0_51 = arith.constant 0 : index
      %c0_52 = arith.constant 0 : index
      %161 = vector.load %arg14[%c0_51, %c0_52] : memref<2x640xf32, #tpu.memory_space<vmem>>, vector<2x640xf32>
      tpu.vector_store %arg14[%c0_51, %c0_52], %160 {strides = array<i32>} : memref<2x640xf32, #tpu.memory_space<vmem>>, vector<2x640xf32>,
    } else {
    }
    return
  }
  func.func @transform_0(%arg0: i32) -> (i32, i32) {
    %c0_i32 = arith.constant 0 : i32
    %c0_i32_0 = arith.constant 0 : i32
    %c0_i32_1 = arith.constant 0 : i32
    return %c0_i32, %c0_i32_0 : i32, i32
  }
  func.func @transform_1(%arg0: i32) -> (i32, i32) {
    %c0_i32 = arith.constant 0 : i32
    %c0_i32_0 = arith.constant 0 : i32
    %c0_i32_1 = arith.constant 0 : i32
    return %c0_i32, %c0_i32_0 : i32, i32
  }
  func.func @transform_2(%arg0: i32) -> (i32, i32) {
    %c0_i32 = arith.constant 0 : i32
    %c0_i32_0 = arith.constant 0 : i32
    %c0_i32_1 = arith.constant 0 : i32
    return %c0_i32, %c0_i32_0 : i32, i32
  }
  func.func @transform_3(%arg0: i32) -> (i32, i32, i32) {
    %c0_i32 = arith.constant 0 : i32
    %c0_i32_0 = arith.constant 0 : i32
    %c0_i32_1 = arith.constant 0 : i32
    %c0_i32_2 = arith.constant 0 : i32
    return %c0_i32, %c0_i32_0, %c0_i32_1 : i32, i32, i32
  }
  func.func @transform_4(%arg0: i32) -> (i32, i32) {
    %c0_i32 = arith.constant 0 : i32
    %c0_i32_0 = arith.constant 0 : i32
    %c0_i32_1 = arith.constant 0 : i32
    return %c0_i32, %c0_i32_0 : i32, i32
  }
  func.func @transform_5(%arg0: i32) -> (i32, i32) {
    %c0_i32 = arith.constant 0 : i32
    %c0_i32_0 = arith.constant 0 : i32
    %c0_i32_1 = arith.constant 0 : i32
    return %c0_i32, %c0_i32_0 : i32, i32
  }
  func.func @transform_6(%arg0: i32) -> (i32, i32, i32) {
    %c0_i32 = arith.constant 0 : i32
    %c0_i32_0 = arith.constant 0 : i32
    %c0_i32_1 = arith.constant 0 : i32
    return %arg0, %c0_i32, %c0_i32_0 : i32, i32, i32
  }
  func.func @transform_7(%arg0: i32) -> (i32, i32, i32) {
    %c0_i32 = arith.constant 0 : i32
    %c0_i32_0 = arith.constant 0 : i32
    %c0_i32_1 = arith.constant 0 : i32
    return %arg0, %c0_i32, %c0_i32_0 : i32, i32, i32
  }
  func.func @transform_8(%arg0: i32) -> (i32, i32, i32) {
    %c0_i32 = arith.constant 0 : i32
    %c0_i32_0 = arith.constant 0 : i32
    %c0_i32_1 = arith.constant 0 : i32
    return %arg0, %c0_i32, %c0_i32_0 : i32, i32, i32
  }
  func.func @transform_9(%arg0: i32) -> (i32, i32, i32) {
    %c0_i32 = arith.constant 0 : i32
    %c0_i32_0 = arith.constant 0 : i32
    %c0_i32_1 = arith.constant 0 : i32
    return %arg0, %c0_i32, %c0_i32_0 : i32, i32, i32
  }
  func.func @transform_10(%arg0: i32) -> (i32, i32, i32) {
    %c0_i32 = arith.constant 0 : i32
    %c0_i32_0 = arith.constant 0 : i32
    %c0_i32_1 = arith.constant 0 : i32
    return %arg0, %c0_i32, %c0_i32_0 : i32, i32, i32
  }
  func.func @transform_12(%arg0: i32) -> (i32, i32) {
    %c0_i32 = arith.constant 0 : i32
    %c0_i32_0 = arith.constant 0 : i32
    %c0_i32_1 = arith.constant 0 : i32
    return %c0_i32, %c0_i32_0 : i32, i32
  }
  func.func @transform_13(%arg0: i32) -> (i32, i32) {
    %c0_i32 = arith.constant 0 : i32
    %c0_i32_0 = arith.constant 0 : i32
    %c0_i32_1 = arith.constant 0 : i32
    return %c0_i32, %c0_i32_0 : i32, i32
  }
}

</mosaic_0001>

<bundles_post_ra>
// kernel: custom_bert_forward.1
= control target key start
LH: loop header
LB: loop body
LE: loop exit
PB: predicated region body
PF: predicated region fallthrough
CT: control target
= control target key end

     0   :  { %s3301_s0 = inlined_call_operand.vmem [shape: f32[16,32], index: 0, kind: input, shape index: {}]   ;;  %s3302_s1 = inlined_call_operand.vmem [shape: f32[16,32], index: 1, kind: input, shape index: {}]   ;;  %s3303_s2 = inlined_call_operand.vmem [shape: f32[8,32], index: 2, kind: input, shape index: {}]   ;;  %s3304_s3 = inlined_call_operand.vmem [shape: f32[8,1,8], index: 3, kind: input, shape index: {}]   ;;  %s3305_s4 = inlined_call_operand.vmem [shape: f32[1,32], index: 4, kind: input, shape index: {}]   ;;  %s3306_s5 = inlined_call_operand.vmem [shape: f32[1,32], index: 5, kind: input, shape index: {}]   ;;  %s3307_s6 = inlined_call_operand.vmem [shape: bf16[2,32,96], index: 6, kind: input, shape index: {}]   ;;  %s3308_s7 = inlined_call_operand.vmem [shape: bf16[2,32,32], index: 7, kind: input, shape index: {}]   ;;  %s3309_s8 = inlined_call_operand.vmem [shape: bf16[2,32,64], index: 8, kind: input, shape index: {}]   ;;  %s3310_s9 = inlined_call_operand.vmem [shape: bf16[2,64,32], index: 9, kind: input, shape index: {}]   ;;  %s3311_s10 = inlined_call_operand.vmem [shape: f32[2,8,96], index: 10, kind: input, shape index: {}]   ;;  %s3312_s11 = inlined_call_operand.vmem [shape: bf16[32,640], index: 11, kind: input, shape index: {}]   ;;  %s3313_s12 = inlined_call_operand.vmem [shape: f32[1,640], index: 12, kind: input, shape index: {}]   ;;  %s3314_s13 = inlined_call_operand.hbm [shape: f32[2,640], index: 13, kind: output, shape index: {}]  }
   0x1   :  { %3316 = sst [smem:[#allocation11_spill]] %s3314_s13 }
   0x2   :  { %18 = vsyncpa [#allocation6], 0  ;;  %s2881_s25 = smov 0  }
   0x3 LB: > { %3317 = sst [smem:[#allocation10_spill]] %s2794_s25  ;;  %s2887_s26 = sadd.s32 4294967295, %s2794_s25   ;;  %s2794_s25 = sphi %s2881_s25, %s24_s25  }
   0x4   : > { %p2362_p0 = scmp.ge.s32.totalorder %s2794_s25, 1  ;;  %p398_p1 = scmp.lt.s32.totalorder %s2794_s25, 3 }
   0x6   : > { %p399_p2 = pnand %p2362_p0, %p398_p1 }
   0x7   : > { %p454_p3 = scmp.lt.s32.totalorder (!%p399_p2), %s2887_s26, 1  ;;  %p2372_p4 = scmp.ne.s32.totalorder (!%p399_p2), %s2887_s26, 0 }
   0x8   : > { %402 = sbr.rel (%p399_p2) target bundleno = 3176 (0xc68), region = 68 }
   0xd   : > { %s455_s27 = scalar_select %p454_p3, %s2887_s26, 1 }
   0xf   : > { %s2434_s28 = sshll.u32 %s455_s27, 4  ;;  %s2437_s29 = sshll.u32 %s455_s27, 5 }
  0x10   : > { %s2896_s15 = scalar_lea.vmem %s3307_s6, %s2434_s28  ;;  %s2901_s18 = scalar_lea.vmem %s3308_s7, %s2434_s28 }
  0x11   : > { %s2906_s21 = scalar_lea.vmem %s3309_s8, %s2434_s28  ;;  %s2911_s24 = scalar_lea.vmem %s3310_s9, %s2437_s29 }
  0x12   : > { %s2371_s25 = sshll.u32 %s455_s27, 3  ;;  %482 = sbr.rel (%p2372_p4) target bundleno = 342 (0x156), region = 72 }
  0x13   : > { %s2916_s14 = scalar_lea.vmem %s3311_s10, %s2371_s25 }
  0x17   : > { %v483_v0 = vld [vmem:[%s3301_s0] sm:$0xff]  ;;  %v484_v4 = vld [vmem:[%s3301_s0 + $0x8] sm:$0xff]  ;;  %vm494_vm0 = vcmask 261120  }
  0x18   : > { %v485_v1 = vld [vmem:[%s3302_s1] sm:$0xff]  ;;  %v486_v5 = vld [vmem:[%s3302_s1 + $0x8] sm:$0xff] }
  0x19   : > { %v489_v2 = vld [vmem:[%s3303_s2] sm:$0xff]  ;;  %v487_v3 = vadd.f32 %v485_v1, %v483_v0  ;;  %v488_v6 = vadd.f32 %v486_v5, %v484_v4 }
  0x1a   : > { %v2373_v28 = vld [vmem:[%s3305_s4] ss:$0 sm:$0xff] }
  0x1b   : > { %v490_v7 = vadd.f32 %v489_v2, %v487_v3  ;;  %v491_v8 = vadd.f32 %v489_v2, %v488_v6  ;;  %v2374_v30 = vld [vmem:[%s3306_s5] ss:$0 sm:$0xff] }
  0x1d   : > { %v495_v9 = vsel %vm494_vm0, %v490_v7, 0.0  ;;  %v498_v10 = vsel %vm494_vm0, %v491_v8, 0.0 }
  0x1e   : > { %496 = vadd.xlane.f32.xlu0 %v495_v9 }
  0x22   : > { %499 = vadd.xlane.f32.xlu0 %v498_v10 }
  0xa7   : > { %v497_v11 = vpop.xlane.xlu0 %496 }
  0xa8   : > { %v502_v12 = vmul.f32 0.03125, %v497_v11 }
  0xaa   : > { %v504_v13 = vsub.f32 %v490_v7, %v502_v12 }
  0xab   : > { %v500_v14 = vpop.xlane.xlu0 %499 }
  0xac   : > { %v503_v15 = vmul.f32 0.03125, %v500_v14  ;;  %v506_v16 = vmul.f32 %v504_v13, %v504_v13 }
  0xae   : > { %v505_v17 = vsub.f32 %v491_v8, %v503_v15  ;;  %v508_v18 = vsel %vm494_vm0, %v506_v16, 0.0 }
  0xaf   : > { %509 = vadd.xlane.f32.xlu1 %v508_v18 }
  0xb0   : > { %v507_v19 = vmul.f32 %v505_v17, %v505_v17 }
  0xb2   : > { %v511_v20 = vsel %vm494_vm0, %v507_v19, 0.0 }
  0xb3   : > { %512 = vadd.xlane.f32.xlu1 %v511_v20 }
 0x138   : > { %v510_v21 = vpop.xlane.xlu1 %509 }
 0x139   : > { %v514_v22 = vmul.f32 0.03125, %v510_v21 }
 0x13b   : > { %v516_v23 = vadd.f32 1e-12, %v514_v22 }
 0x13c   : > { %v513_v24 = vpop.xlane.xlu1 %512 }
 0x13d   : > { %2656 = vrsqrt.f32 %v516_v23  ;;  %v515_v25 = vmul.f32 0.03125, %v513_v24 }
 0x13f   : > { %v517_v26 = vadd.f32 1e-12, %v515_v25 }
 0x141   : > { %2658 = vrsqrt.f32 %v517_v26 }
 0x14a   : > { %v2657_v27 = vpop.eup %2656 }
 0x14b   : > { %v520_v29 = vmul.f32 %v2657_v27, %v504_v13 }
 0x14d   : > { %v528_v31 = vmul.f32 %v2373_v28, %v520_v29 }
 0x14e   : > { %v2659_v32 = vpop.eup %2658 }
 0x14f   : > { %v536_v33 = vadd.f32 %v2374_v30, %v528_v31  ;;  %v521_v34 = vmul.f32 %v2659_v32, %v505_v17 }
 0x151   : > { %538 = vst.msk [vmem:[#allocation2] sm:$0xff] %vm494_vm0, %v536_v33  ;;  %v529_v35 = vmul.f32 %v2373_v28, %v521_v34 }
 0x153   : > { %v537_v36 = vadd.f32 %v2374_v30, %v529_v35 }
 0x155   : > { %539 = vst.msk [vmem:[#allocation2 + $0x8] sm:$0xff] %vm494_vm0, %v537_v36 }
 0x156 PF: > { %p2375_p5 = scmp.ne.s32.totalorder %s2887_s26, 1 }
 0x158   : > { %543 = sbr.rel (%p2375_p5) target bundleno = 356 (0x164), region = 76 }
 0x15d   : > { %v577_v37 = vld [vmem:[%s3312_s11] sm:$0xff]  ;;  %v579_v38 = vld [vmem:[%s3312_s11 + $0x8] sm:$0xff]  ;;  %v581_v39 = vld [vmem:[%s3312_s11 + $0x10] sm:$0xff] }
 0x15e   : > { %578 = vst [vmem:[#allocation3] sm:$0xff] %v577_v37  ;;  %580 = vst [vmem:[#allocation3 + $0x8] sm:$0xff] %v579_v38  ;;  %v583_v40 = vld [vmem:[%s3312_s11 + $0x18] sm:$0xff]  ;;  %v585_v41 = vld [vmem:[%s3312_s11 + $0x20] sm:$0xff] }
 0x15f   : > { %582 = vst [vmem:[#allocation3 + $0x10] sm:$0xff] %v581_v39  ;;  %v587_v42 = vld [vmem:[%s3312_s11 + $0x28] sm:$0xff]  ;;  %584 = vst [vmem:[#allocation3 + $0x18] sm:$0xff] %v583_v40  ;;  %v589_v43 = vld [vmem:[%s3312_s11 + $0x30] sm:$0xff] }
 0x160   : > { %586 = vst [vmem:[#allocation3 + $0x20] sm:$0xff] %v585_v41  ;;  %588 = vst [vmem:[#allocation3 + $0x28] sm:$0xff] %v587_v42  ;;  %v591_v44 = vld [vmem:[%s3312_s11 + $0x38] sm:$0xff]  ;;  %v593_v45 = vld [vmem:[%s3312_s11 + $0x40] sm:$0xff] }
 0x161   : > { %590 = vst [vmem:[#allocation3 + $0x30] sm:$0xff] %v589_v43  ;;  %592 = vst [vmem:[#allocation3 + $0x38] sm:$0xff] %v591_v44  ;;  %v595_v46 = vld [vmem:[%s3312_s11 + $0x48] sm:$0xff] }
 0x162   : > { %594 = vst [vmem:[#allocation3 + $0x40] sm:$0xff] %v593_v45  ;;  %596 = vst [vmem:[#allocation3 + $0x48] sm:$0xff] %v595_v46 }
 0x163   : > { %604 = vsyncadd [#allocation4], 1280 }
 0x164 PF: > { %v2690_v47 = vld [vmem:[%s2896_s15 + $0x8] sm:$0xff]   ;;  %v2796_v48 = vmov 0.0   ;;  %v2691_v49 = vld [vmem:[%s2896_s15] sm:$0xff]   ;;  %vm2797_vm1 = vmmov 0   ;;  %vm629_vm2 = vcmask 261120   ;;  %v613_v53 = vlaneseq  ;;  %s2798_s15 = smov 104  }
 0x165   : > { %2487 = vmatprep.subr.bf16.mxu0 %v2796_v48  ;;  %2495 = vmatprep.subr.bf16.mxu1 %v2796_v48  ;;  %v2985_v50 = vld [vmem:[#allocation2] sm:$0xff]  ;;  %v2987_v51 = vld [vmem:[#allocation2 + $0x8] sm:$0xff]  ;;  %s2799_s23 = smov 120   ;;  %s2800_s30 = smov 96   ;;  %vm705_vm3 = vcmask 64512   ;;  %vm1268_vm4 = vcmask 1043456  }
 0x166   : > { %2488 = vmatpush3.bf16.msra.mxu0 %v2690_v47  ;;  %2491 = vmatprep.mubr.msk.bf16.mxu0 %vm2797_vm1, %v2796_v48  ;;  %v608_v52 = vpack.c.bf16 %v2987_v51, %v2985_v50  ;;  %v2998_v54 = vshrl.u32 %v613_v53, 7  ;;  %v3002_v56 = vld [vmem:[%s2916_s14] sm:$0xff]  ;;  %s2801_s14 = smov 112   ;;  %s2802_s16 = smov 64   ;;  %vm1674_vm5 = vcmask 130048   ;;  %vm1677_vm6 = vcmask 195584  }
 0x167   : > { %2489 = vmatprep.subr.bf16.mxu0 %v2796_v48  ;;  %2497 = vmatprep.mubr.msk.bf16.mxu1 %vm2797_vm1, %v2796_v48  ;;  %v2387_v39 = vld [vmem:[%s3304_s3] ss:$0 sm:$0xff]  ;;  %v2388_v45 = vld [vmem:[%s3304_s3 + $0x1] ss:$0 sm:$0xff]  ;;  %s2804_s20 = smov 16   ;;  %s2805_s29 = smov 24  }
 0x168   : > { %v615_v55 = vsub.s32 0, %v2998_v54  ;;  %vm1898_vm7 = vcmask 523264  }
 0x16a   : > { %2490 = vmatpush3.bf16.msra.mxu0 %v2691_v49  ;;  %v616_v58 = vrot.slane %v3002_v56, %v615_v55 }
 0x16b   : > { %2501 = vmatprep.subr.bf16.mxu0 %v2796_v48 }
 0x16d   : > { %2492 = vmatmul.mubr.msk.bf16.vlgmr.msra.gmra.mxu0 %vm629_vm2, %v608_v52 }
 0x16e   : > { %2503 = vmatprep.mubr.msk.bf16.mxu0 %vm2797_vm1, %v2796_v48 }
 0x22d   : > { %v667_v57 = vpop.f32.mrf.mxu0 }
 0x22e   : > { %v668_v61 = vadd.f32 %v667_v57, %v616_v58 }
 0x22f   : > { %v2493_v59 = vpop.f32.mrf.mxu0 }
 0x230   : > { %v694_v1 = vpack.c.bf16 %v668_v61, %v668_v61 }
 0x231   : > { %v670_v60 = vpop.f32.mrf.mxu0 }
 0x232   : > { %v671_v62 = vadd.f32 %v670_v60, %v616_v58 }
 0x233   : > { %v2494_v63 = vpop.f32.mrf.mxu0 }
 0x234   : > { %v2670_v0 = vpack.i.bf16 %v671_v62, %v668_v61  ;;  %v695_v2 = vpack.c.bf16 %v671_v62, %v671_v62  ;;  %v2389_v62 = vld [vmem:[%s3304_s3 + $0x2] ss:$0 sm:$0xff]  ;;  %v2390_v63 = vld [vmem:[%s3304_s3 + $0x3] ss:$0 sm:$0xff] }
 0x236   : > { %2671 = vrot.lane.b32.xlu1 %v2670_v0, %s2798_s15  ;;  %2661 = vrot.lane.b32.xlu0 %v2670_v0, %s2799_s23 }
 0x23a   : > { %703 = vrot.lane.b32.xlu1 %v694_v1, %s2800_s30  ;;  %2666 = vrot.lane.b32.xlu0 %v2670_v0, %s2801_s14 }
 0x23e   : > { %753 = vrot.lane.b32.xlu0 %v695_v2, %s2800_s30 }
 0x2a8   : > { %v2672_v3 = vpop.permute.xlu1 %2671  ;;  %v2662_v4 = vpop.permute.xlu0 %2661 }
 0x2a9   : > { %v2664_v5 = vunpack.i.h.bf16 %v2662_v4  ;;  %v2663_v6 = vunpack.i.l.bf16 %v2662_v4  ;;  %v2673_v14 = vunpack.i.l.bf16 %v2672_v3  ;;  %v2674_v17 = vunpack.i.h.bf16 %v2672_v3 }
 0x2ab   : > { %v3009_v7 = vpack.c.bf16 %v2664_v5, %v2664_v5  ;;  %v3011_v8 = vpack.c.bf16 %v2663_v6, %v2663_v6  ;;  %v3028_v20 = vpack.c.bf16 %v2673_v14, %v2673_v14  ;;  %v3031_v21 = vpack.c.bf16 %v2674_v17, %v2674_v17 }
 0x2ac   : > { %v704_v9 = vpop.permute.xlu1 %703  ;;  %v2667_v10 = vpop.permute.xlu0 %2666 }
 0x2ad   : > { %v2669_v11 = vunpack.i.h.bf16 %v2667_v10  ;;  %v2668_v12 = vunpack.i.l.bf16 %v2667_v10  ;;  %802 = vrot.lane.b32.xlu1 %v3011_v8, %s2800_s30  ;;  %851 = vrot.lane.b32.xlu0 %v3009_v7, %s2800_s30  ;;  %v710_v13 = vsel %vm705_vm3, %v704_v9, 0 }
 0x2ae   : > { %2496 = vmatpush3.bf16.xpose.msra.mxu1 %v710_v13 }
 0x2af   : > { %v3018_v15 = vpack.c.bf16 %v2669_v11, %v2669_v11  ;;  %v3020_v16 = vpack.c.bf16 %v2668_v12, %v2668_v12  ;;  %2507 = vmatprep.subr.bf16.mxu1 %v2796_v48 }
 0x2b0   : > { %v754_v18 = vpop.permute.xlu0 %753 }
 0x2b1   : > { %v759_v19 = vsel %vm705_vm3, %v754_v18, 0  ;;  %900 = vrot.lane.b32.xlu1 %v3020_v16, %s2800_s30  ;;  %949 = vrot.lane.b32.xlu0 %v3018_v15, %s2800_s30  ;;  %v2391_v18 = vld [vmem:[%s3304_s3 + $0x4] ss:$0 sm:$0xff] }
 0x2b2   : > { %2502 = vmatpush3.bf16.xpose.msra.mxu0 %v759_v19  ;;  %v2392_v19 = vld [vmem:[%s3304_s3 + $0x5] ss:$0 sm:$0xff] }
 0x2b3   : > { %2513 = vmatprep.subr.bf16.mxu0 %v2796_v48 }
 0x2b5   : > { %2498 = vmatmul.mubr.msk.bf16.vlgmr.msra.gmra.mxu1 %vm705_vm3, %v694_v1  ;;  %998 = vrot.lane.b32.xlu1 %v3028_v20, %s2800_s30 }
 0x2b6   : > { %1047 = vrot.lane.b32.xlu0 %v3031_v21, %s2800_s30  ;;  %2509 = vmatprep.mubr.msk.bf16.mxu1 %vm2797_vm1, %v2796_v48 }
 0x2b9   : > { %1312 = vrot.lane.b32.xlu1 %v695_v2, %s2802_s16  ;;  %2504 = vmatmul.mubr.msk.bf16.vlgmr.msra.gmra.mxu0 %vm705_vm3, %v695_v2 }
 0x2ba   : > { %1263 = vrot.lane.b32.xlu0 %v694_v1, %s2802_s16  ;;  %2515 = vmatprep.mubr.msk.bf16.mxu0 %vm2797_vm1, %v2796_v48 }
 0x31f   : > { %v803_v22 = vpop.permute.xlu1 %802  ;;  %v852_v23 = vpop.permute.xlu0 %851 }
 0x320   : > { %v808_v24 = vsel %vm705_vm3, %v803_v22, 0  ;;  %v857_v25 = vsel %vm705_vm3, %v852_v23, 0 }
 0x321   : > { %2508 = vmatpush3.bf16.xpose.msra.mxu1 %v808_v24  ;;  %2514 = vmatpush3.bf16.xpose.msra.mxu0 %v857_v25 }
 0x322   : > { %2519 = vmatprep.subr.bf16.mxu1 %v2796_v48  ;;  %2525 = vmatprep.subr.bf16.mxu0 %v2796_v48 }
 0x323   : > { %v901_v26 = vpop.permute.xlu1 %900  ;;  %v950_v27 = vpop.permute.xlu0 %949 }
 0x324   : > { %v906_v28 = vsel %vm705_vm3, %v901_v26, 0  ;;  %v955_v29 = vsel %vm705_vm3, %v950_v27, 0 }
 0x327   : > { %v999_v30 = vpop.permute.xlu1 %998 }
 0x328   : > { %2510 = vmatmul.mubr.msk.bf16.vlgmr.msra.gmra.mxu1 %vm705_vm3, %v3011_v8  ;;  %2516 = vmatmul.mubr.msk.bf16.vlgmr.msra.gmra.mxu0 %vm705_vm3, %v3009_v7  ;;  %v1048_v31 = vpop.permute.xlu0 %1047  ;;  %v1004_v32 = vsel %vm705_vm3, %v999_v30, 0 }
 0x329   : > { %2520 = vmatpush3.bf16.xpose.msra.mxu1 %v906_v28  ;;  %2526 = vmatpush3.bf16.xpose.msra.mxu0 %v955_v29  ;;  %v1053_v33 = vsel %vm705_vm3, %v1048_v31, 0 }
 0x32a   : > { %2521 = vmatprep.mubr.msk.bf16.mxu1 %vm2797_vm1, %v2796_v48  ;;  %2527 = vmatprep.mubr.msk.bf16.mxu0 %vm2797_vm1, %v2796_v48 }
 0x32b   : > { %2531 = vmatprep.subr.bf16.mxu1 %v2796_v48  ;;  %2537 = vmatprep.subr.bf16.mxu0 %v2796_v48  ;;  %v1313_v34 = vpop.permute.xlu1 %1312 }
 0x32c   : > { %v1264_v35 = vpop.permute.xlu0 %1263  ;;  %v1318_v36 = vsel %vm1268_vm4, %v1313_v34, 0 }
 0x32d   : > { %v1270_v37 = vsel %vm1268_vm4, %v1264_v35, 0 }
 0x330   : > { %2522 = vmatmul.mubr.msk.bf16.vlgmr.msra.gmra.mxu1 %vm705_vm3, %v3020_v16  ;;  %2528 = vmatmul.mubr.msk.bf16.vlgmr.msra.gmra.mxu0 %vm705_vm3, %v3018_v15 }
 0x331   : > { %2532 = vmatpush3.bf16.xpose.msra.mxu1 %v1004_v32  ;;  %2538 = vmatpush3.bf16.xpose.msra.mxu0 %v1053_v33 }
 0x332   : > { %2533 = vmatprep.mubr.msk.bf16.mxu1 %vm2797_vm1, %v2796_v48  ;;  %2539 = vmatprep.mubr.msk.bf16.mxu0 %vm2797_vm1, %v2796_v48 }
 0x333   : > { %2543 = vmatprep.subr.bf16.mxu1 %v2796_v48  ;;  %2549 = vmatprep.subr.bf16.mxu0 %v2796_v48 }
 0x338   : > { %2534 = vmatmul.mubr.msk.bf16.vlgmr.msra.gmra.mxu1 %vm705_vm3, %v3028_v20  ;;  %2540 = vmatmul.mubr.msk.bf16.vlgmr.msra.gmra.mxu0 %vm705_vm3, %v3031_v21 }
 0x339   : > { %2544 = vmatpush3.bf16.msra.mxu1 %v1270_v37  ;;  %2550 = vmatpush3.bf16.msra.mxu0 %v1318_v36  ;;  %v2393_v36 = vld [vmem:[%s3304_s3 + $0x6] ss:$0 sm:$0xff]  ;;  %v2394_v37 = vld [vmem:[%s3304_s3 + $0x7] ss:$0 sm:$0xff] }
 0x33a   : > { %2545 = vmatprep.mubr.msk.bf16.mxu1 %vm2797_vm1, %v2796_v48  ;;  %2551 = vmatprep.mubr.msk.bf16.mxu0 %vm2797_vm1, %v2796_v48 }
 0x33b   : > { %2555 = vmatprep.subr.bf16.mxu1 %v2796_v48  ;;  %2561 = vmatprep.subr.bf16.mxu0 %v2796_v48 }
 0x375   : > { %v746_v38 = vpop.f32.mrf.mxu1 }
 0x376   : > { %v1095_v40 = vmul.f32 0.35355338, %v746_v38 }
 0x377   : > { %v2499_v41 = vpop.f32.mrf.mxu1 }
 0x378   : > { %v3088_v42 = vadd.f32 %v2387_v39, %v1095_v40 }
 0x379   : > { %v749_v43 = vpop.f32.mrf.mxu1  ;;  %v795_v44 = vpop.f32.mrf.mxu0 }
 0x37a   : > { %v1096_v46 = vmul.f32 0.35355338, %v795_v44  ;;  %v1167_v47 = vsel %vm705_vm3, %v3088_v42, -inf }
 0x37b   : > { %v2500_v49 = vpop.f32.mrf.mxu1  ;;  %1168 = vmax.xlane.f32.xlu1 %v1167_v47  ;;  %v2505_v52 = vpop.f32.mrf.mxu0 }
 0x37c   : > { %v3095_v53 = vadd.f32 %v2388_v45, %v1096_v46 }
 0x37d   : > { %v798_v57 = vpop.f32.mrf.mxu0 }
 0x37e   : > { %v1170_v58 = vsel %vm705_vm3, %v3095_v53, -inf }
 0x37f   : > { %1171 = vmax.xlane.f32.xlu0 %v1170_v58  ;;  %v2506_v59 = vpop.f32.mrf.mxu0 }
 0x3e8   : > { %v844_v60 = vpop.f32.mrf.mxu1  ;;  %v893_v61 = vpop.f32.mrf.mxu0 }
 0x3e9   : > { %v1097_v0 = vmul.f32 0.35355338, %v844_v60  ;;  %v1098_v1 = vmul.f32 0.35355338, %v893_v61 }
 0x3ea   : > { %v2511_v2 = vpop.f32.mrf.mxu1  ;;  %v2517_v3 = vpop.f32.mrf.mxu0 }
 0x3eb   : > { %v3105_v4 = vadd.f32 %v2389_v62, %v1097_v0  ;;  %v3107_v5 = vadd.f32 %v2390_v63, %v1098_v1 }
 0x3ec   : > { %v847_v6 = vpop.f32.mrf.mxu1  ;;  %v896_v9 = vpop.f32.mrf.mxu0 }
 0x3ed   : > { %v1173_v10 = vsel %vm705_vm3, %v3105_v4, -inf  ;;  %v1176_v11 = vsel %vm705_vm3, %v3107_v5, -inf }
 0x3ee   : > { %v2512_v12 = vpop.f32.mrf.mxu1  ;;  %1174 = vmax.xlane.f32.xlu0 %v1173_v10  ;;  %1177 = vmax.xlane.f32.xlu1 %v1176_v11  ;;  %v2518_v13 = vpop.f32.mrf.mxu0 }
 0x3f0   : > { %v942_v14 = vpop.f32.mrf.mxu1  ;;  %v991_v17 = vpop.f32.mrf.mxu0 }
 0x3f1   : > { %v1099_v22 = vmul.f32 0.35355338, %v942_v14  ;;  %v1100_v23 = vmul.f32 0.35355338, %v991_v17 }
 0x3f2   : > { %v2523_v24 = vpop.f32.mrf.mxu1  ;;  %v2529_v25 = vpop.f32.mrf.mxu0 }
 0x3f3   : > { %v3119_v26 = vadd.f32 %v2391_v18, %v1099_v22  ;;  %v1164_v27 = vadd.f32 %v2392_v19, %v1100_v23 }
 0x3f4   : > { %v945_v28 = vpop.f32.mrf.mxu1  ;;  %v994_v29 = vpop.f32.mrf.mxu0 }
 0x3f5   : > { %v1179_v30 = vsel %vm705_vm3, %v3119_v26, -inf  ;;  %v1182_v31 = vsel %vm705_vm3, %v1164_v27, -inf }
 0x3f6   : > { %v2524_v32 = vpop.f32.mrf.mxu1  ;;  %1180 = vmax.xlane.f32.xlu0 %v1179_v30  ;;  %1183 = vmax.xlane.f32.xlu1 %v1182_v31  ;;  %v2530_v33 = vpop.f32.mrf.mxu0 }
 0x3f8   : > { %v1040_v34 = vpop.f32.mrf.mxu1  ;;  %v1089_v35 = vpop.f32.mrf.mxu0 }
 0x3f9   : > { %v1101_v38 = vmul.f32 0.35355338, %v1040_v34  ;;  %v1102_v39 = vmul.f32 0.35355338, %v1089_v35 }
 0x3fa   : > { %v2535_v40 = vpop.f32.mrf.mxu1  ;;  %v2541_v41 = vpop.f32.mrf.mxu0 }
 0x3fb   : > { %v3130_v43 = vadd.f32 %v2393_v36, %v1101_v38  ;;  %v1166_v44 = vadd.f32 %v2394_v37, %v1102_v39 }
 0x3fc   : > { %v1043_v45 = vpop.f32.mrf.mxu1  ;;  %v1092_v46 = vpop.f32.mrf.mxu0 }
 0x3fd   : > { %v1185_v47 = vsel %vm705_vm3, %v3130_v43, -inf  ;;  %v1188_v49 = vsel %vm705_vm3, %v1166_v44, -inf }
 0x3fe   : > { %v2536_v52 = vpop.f32.mrf.mxu1  ;;  %1186 = vmax.xlane.f32.xlu0 %v1185_v47  ;;  %1189 = vmax.xlane.f32.xlu1 %v1188_v49  ;;  %v2542_v57 = vpop.f32.mrf.mxu0 }
 0x404   : > { %v1169_v58 = vpop.xlane.xlu1 %1168 }
 0x405   : > { %v1191_v60 = vsub.f32 %v3088_v42, %v1169_v58 }
 0x407   : > { %v1199_v62 = vmul.f32 1.442695, %v1191_v60 }
 0x408   : > { %v1172_v59 = vpop.xlane.xlu0 %1171 }
 0x409   : > { %v1192_v61 = vsub.f32 %v3095_v53, %v1172_v59  ;;  %2700 = vpow2.f32 %v1199_v62 }
 0x40b   : > { %v1201_v63 = vmul.f32 1.442695, %v1192_v61 }
 0x40d   : > { %2702 = vpow2.f32 %v1201_v63 }
 0x40f   : > { %1360 = vrot.lane.b32.xlu1 %v3011_v8, %s2802_s16 }
 0x414   : > { %1408 = vrot.lane.b32.xlu0 %v3009_v7, %s2802_s16 }
 0x416   : > { %v2701_v0 = vpop.eup %2700 }
 0x417   : > { %v1215_v2 = vsel %vm705_vm3, %v2701_v0, 0.0 }
 0x41a   : > { %v2703_v1 = vpop.eup %2702 }
 0x41b   : > { %v1218_v3 = vsel %vm705_vm3, %v2703_v1, 0.0 }
 0x433   : > { %1216 = vadd.xlane.f32.xlu0 %v1215_v2  ;;  %1219 = vadd.xlane.f32.xlu1 %v1218_v3 }
 0x444   : > { %1456 = vrot.lane.b32.xlu1 %v3020_v16, %s2802_s16 }
 0x477   : > { %v1175_v7 = vpop.xlane.xlu0 %1174  ;;  %v1178_v8 = vpop.xlane.xlu1 %1177 }
 0x478   : > { %v1193_v42 = vsub.f32 %v3105_v4, %v1175_v7  ;;  %v1194_v53 = vsub.f32 %v3107_v5, %v1178_v8 }
 0x47a   : > { %v1203_v6 = vmul.f32 1.442695, %v1193_v42  ;;  %v1205_v9 = vmul.f32 1.442695, %v1194_v53 }
 0x47c   : > { %2704 = vpow2.f32 %v1203_v6 }
 0x47d   : > { %2706 = vpow2.f32 %v1205_v9 }
 0x47f   : > { %v1184_v10 = vpop.xlane.xlu1 %1183  ;;  %v1181_v25 = vpop.xlane.xlu0 %1180 }
 0x480   : > { %v1196_v11 = vsub.f32 %v1164_v27, %v1184_v10  ;;  %v1195_v27 = vsub.f32 %v3119_v26, %v1181_v25 }
 0x482   : > { %v1209_v12 = vmul.f32 1.442695, %v1196_v11  ;;  %v1207_v29 = vmul.f32 1.442695, %v1195_v27 }
 0x484   : > { %2708 = vpow2.f32 %v1209_v12 }
 0x487   : > { %v1190_v13 = vpop.xlane.xlu1 %1189  ;;  %v1187_v28 = vpop.xlane.xlu0 %1186 }
 0x488   : > { %v1198_v14 = vsub.f32 %v1166_v44, %v1190_v13  ;;  %v1197_v30 = vsub.f32 %v3130_v43, %v1187_v28 }
 0x489   : > { %v2705_v17 = vpop.eup %2704 }
 0x48a   : > { %v2707_v18 = vpop.eup %2706  ;;  %v1213_v19 = vmul.f32 1.442695, %v1198_v14  ;;  %v1221_v16 = vsel %vm705_vm3, %v2705_v17, 0.0  ;;  %v1211_v31 = vmul.f32 1.442695, %v1197_v30 }
 0x48b   : > { %1222 = vadd.xlane.f32.xlu0 %v1221_v16  ;;  %v1224_v4 = vsel %vm705_vm3, %v2707_v18, 0.0  ;;  %v1409_v32 = vpop.permute.xlu0 %1408  ;;  %v1361_v33 = vpop.permute.xlu1 %1360 }
 0x48c   : > { %1225 = vadd.xlane.f32.xlu1 %v1224_v4  ;;  %2710 = vpow2.f32 %v1213_v19  ;;  %v1366_v44 = vsel %vm1268_vm4, %v1361_v33, 0  ;;  %v1414_v45 = vsel %vm1268_vm4, %v1409_v32, 0 }
 0x48d   : > { %2712 = vpow2.f32 %v1207_v29 }
 0x48e   : > { %2714 = vpow2.f32 %v1211_v31 }
 0x491   : > { %v3149_v5 = vpop.eup %2708 }
 0x492   : > { %v1230_v22 = vsel %vm705_vm3, %v3149_v5, 0.0 }
 0x493   : > { %1231 = vadd.xlane.f32.xlu1 %v1230_v22 }
 0x499   : > { %v3153_v23 = vpop.eup %2710 }
 0x49a   : > { %v1236_v24 = vsel %vm705_vm3, %v3153_v23, 0.0  ;;  %v3163_v34 = vpop.eup %2712 }
 0x49b   : > { %1237 = vadd.xlane.f32.xlu1 %v1236_v24  ;;  %v3167_v26 = vpop.eup %2714 }
 0x4a1   : > { %1504 = vrot.lane.b32.xlu0 %v3018_v15, %s2802_s16  ;;  %v1227_v15 = vsel %vm705_vm3, %v3163_v34, 0.0 }
 0x4ac   : > { %1552 = vrot.lane.b32.xlu1 %v3028_v20, %s2802_s16  ;;  %v1233_v20 = vsel %vm705_vm3, %v3167_v26, 0.0 }
 0x4bc   : > { %v1217_v35 = vpop.xlane.xlu0 %1216  ;;  %v1220_v36 = vpop.xlane.xlu1 %1219 }
 0x4bd   : > { %2716 = vrcp.f32 %v1217_v35 }
 0x4be   : > { %2718 = vrcp.f32 %v1220_v36 }
 0x4c0   : > { %1228 = vadd.xlane.f32.xlu0 %v1227_v15  ;;  %v1457_v46 = vpop.permute.xlu1 %1456 }
 0x4c4   : > { %1234 = vadd.xlane.f32.xlu0 %v1233_v20 }
 0x4ca   : > { %v2717_v37 = vpop.eup %2716 }
 0x4cb   : > { %v2719_v38 = vpop.eup %2718  ;;  %v1247_v39 = vmul.f32 %v2717_v37, %v2701_v0  ;;  %v1462_v0 = vsel %vm1268_vm4, %v1457_v46, 0 }
 0x4cc   : > { %v1248_v40 = vmul.f32 %v2719_v38, %v2703_v1 }
 0x4cd   : > { %v1255_v41 = vpack.c.bf16 %v1247_v39, %v1247_v39 }
 0x4ce   : > { %v1256_v43 = vpack.c.bf16 %v1248_v40, %v1248_v40  ;;  %v2692_v40 = vld [vmem:[%s2901_s18 + $0x8] sm:$0xff]  }
 0x4cf   : > { %2546 = vmatmul.mubr.msk.bf16.vlgmr.msra.gmra.mxu1 %vm705_vm3, %v1255_v41 }
 0x4d0   : > { %2552 = vmatmul.mubr.msk.bf16.vlgmr.msra.gmra.mxu0 %vm705_vm3, %v1256_v43  ;;  %2556 = vmatpush3.bf16.msra.mxu1 %v1366_v44 }
 0x4d1   : > { %2562 = vmatpush3.bf16.msra.mxu0 %v1414_v45  ;;  %2557 = vmatprep.mubr.msk.bf16.mxu1 %vm2797_vm1, %v2796_v48 }
 0x4d2   : > { %2563 = vmatprep.mubr.msk.bf16.mxu0 %vm2797_vm1, %v2796_v48  ;;  %2567 = vmatprep.subr.bf16.mxu1 %v2796_v48 }
 0x4d3   : > { %2573 = vmatprep.subr.bf16.mxu0 %v2796_v48 }
 0x4da   : > { %1600 = vrot.lane.b32.xlu0 %v3031_v21, %s2802_s16  ;;  %s2803_s16 = smov 8  }
 0x514   : > { %v1223_v47 = vpop.xlane.xlu0 %1222 }
 0x515   : > { %2720 = vrcp.f32 %v1223_v47  ;;  %v1226_v49 = vpop.xlane.xlu1 %1225  ;;  %v2693_v47 = vld [vmem:[%s2901_s18] sm:$0xff]  }
 0x516   : > { %2722 = vrcp.f32 %v1226_v49 }
 0x518   : > { %v1505_v61 = vpop.permute.xlu0 %1504 }
 0x519   : > { %v1510_v21 = vsel %vm1268_vm4, %v1505_v61, 0 }
 0x51c   : > { %v1232_v52 = vpop.xlane.xlu1 %1231 }
 0x51d   : > { %2724 = vrcp.f32 %v1232_v52 }
 0x522   : > { %v2721_v57 = vpop.eup %2720 }
 0x523   : > { %v2723_v58 = vpop.eup %2722  ;;  %v1249_v59 = vmul.f32 %v2721_v57, %v2705_v17 }
 0x524   : > { %v1250_v60 = vmul.f32 %v2723_v58, %v2707_v18  ;;  %v1238_v7 = vpop.xlane.xlu1 %1237 }
 0x525   : > { %v1257_v62 = vpack.c.bf16 %v1249_v59, %v1249_v59  ;;  %2726 = vrcp.f32 %v1238_v7 }
 0x526   : > { %v1258_v63 = vpack.c.bf16 %v1250_v60, %v1250_v60 }
 0x527   : > { %2558 = vmatmul.mubr.msk.bf16.vlgmr.msra.gmra.mxu1 %vm705_vm3, %v1257_v62 }
 0x528   : > { %2564 = vmatmul.mubr.msk.bf16.vlgmr.msra.gmra.mxu0 %vm705_vm3, %v1258_v63  ;;  %2568 = vmatpush3.bf16.msra.mxu1 %v1462_v0  ;;  %v1553_v14 = vpop.permute.xlu1 %1552 }
 0x529   : > { %2574 = vmatpush3.bf16.msra.mxu0 %v1510_v21  ;;  %2575 = vmatprep.mubr.msk.bf16.mxu0 %vm2797_vm1, %v2796_v48  ;;  %v1558_v19 = vsel %vm1268_vm4, %v1553_v14, 0 }
 0x52a   : > { %2585 = vmatprep.subr.bf16.mxu0 %v2796_v48  ;;  %2569 = vmatprep.mubr.msk.bf16.mxu1 %vm2797_vm1, %v2796_v48  ;;  %v2725_v1 = vpop.eup %2724 }
 0x52b   : > { %2579 = vmatprep.subr.bf16.mxu1 %v2796_v48  ;;  %v1252_v2 = vmul.f32 %v2725_v1, %v3149_v5 }
 0x52d   : > { %v1260_v3 = vpack.c.bf16 %v1252_v2, %v1252_v2 }
 0x530   : > { %2576 = vmatmul.mubr.msk.bf16.vlgmr.msra.gmra.mxu0 %vm705_vm3, %v1260_v3 }
 0x531   : > { %2587 = vmatprep.mubr.msk.bf16.mxu0 %vm2797_vm1, %v2796_v48 }
 0x532   : > { %v2727_v42 = vpop.eup %2726 }
 0x533   : > { %v1254_v6 = vmul.f32 %v2727_v42, %v3153_v23 }
 0x535   : > { %v1262_v11 = vpack.c.bf16 %v1254_v6, %v1254_v6 }
 0x549   : > { %v1229_v8 = vpop.xlane.xlu0 %1228 }
 0x54a   : > { %2728 = vrcp.f32 %v1229_v8 }
 0x54d   : > { %v1235_v53 = vpop.xlane.xlu0 %1234 }
 0x54e   : > { %2730 = vrcp.f32 %v1235_v53 }
 0x551   : > { %v1601_v9 = vpop.permute.xlu0 %1600 }
 0x552   : > { %v1606_v10 = vsel %vm1268_vm4, %v1601_v9, 0 }
 0x553   : > { %2586 = vmatpush3.bf16.msra.mxu0 %v1606_v10 }
 0x554   : > { %2599 = vmatprep.subr.bf16.mxu0 %v2796_v48 }
 0x556   : > { %2588 = vmatmul.mubr.msk.bf16.vlgmr.msra.gmra.mxu0 %vm705_vm3, %v1262_v11 }
 0x557   : > { %v2729_v12 = vpop.eup %2728  ;;  %2603 = vmatprep.mubr.msk.bf16.mxu0 %vm2797_vm1, %v2796_v48 }
 0x558   : > { %v1251_v13 = vmul.f32 %v2729_v12, %v3163_v34 }
 0x55a   : > { %v1259_v17 = vpack.c.bf16 %v1251_v13, %v1251_v13 }
 0x55b   : > { %v2731_v18 = vpop.eup %2730 }
 0x55c   : > { %2570 = vmatmul.mubr.msk.bf16.vlgmr.msra.gmra.mxu1 %vm705_vm3, %v1259_v17  ;;  %v1253_v16 = vmul.f32 %v2731_v18, %v3167_v26  ;;  %v1687_v17 = vsub.s32 1, %v2998_v54 }
 0x55d   : > { %2580 = vmatpush3.bf16.msra.mxu1 %v1558_v19  ;;  %2581 = vmatprep.mubr.msk.bf16.mxu1 %vm2797_vm1, %v2796_v48 }
 0x55e   : > { %2591 = vmatprep.subr.bf16.mxu1 %v2796_v48  ;;  %v1261_v4 = vpack.c.bf16 %v1253_v16, %v1253_v16  ;;  %v1688_v18 = vrot.slane %v3002_v56, %v1687_v17 }
 0x564   : > { %2582 = vmatmul.mubr.msk.bf16.vlgmr.msra.gmra.mxu1 %vm705_vm3, %v1261_v4 }
 0x565   : > { %2595 = vmatprep.mubr.msk.bf16.mxu1 %vm2797_vm1, %v2796_v48  ;;  %2592 = vmatpush3.bf16.msra.mxu1 %v2692_v40 }
 0x566   : > { %2593 = vmatprep.subr.bf16.mxu1 %v2796_v48 }
 0x569   : > { %2594 = vmatpush3.bf16.msra.mxu1 %v2693_v47  ;;  %v1782_v47 = vsub.s32 3, %v2998_v54 }
 0x56a   : > { %2607 = vmatprep.subr.bf16.mxu1 %v2796_v48 }
 0x58f   : > { %v1306_v5 = vpop.f32.mrf.mxu1 }
 0x590   : > { %v1354_v22 = vpop.f32.mrf.mxu0 }
 0x591   : > { %v2547_v23 = vpop.f32.mrf.mxu1 }
 0x592   : > { %v2553_v24 = vpop.f32.mrf.mxu0 }
 0x593   : > { %v1309_v25 = vpop.f32.mrf.mxu1 }
 0x594   : > { %v1357_v27 = vpop.f32.mrf.mxu0 }
 0x595   : > { %v2548_v28 = vpop.f32.mrf.mxu1 }
 0x596   : > { %v2554_v29 = vpop.f32.mrf.mxu0 }
 0x5e7   : > { %v1402_v30 = vpop.f32.mrf.mxu1 }
 0x5e8   : > { %v1450_v31 = vpop.f32.mrf.mxu0 }
 0x5e9   : > { %v2675_v32 = vpack.i.bf16 %v1450_v31, %v1402_v30  ;;  %v2559_v33 = vpop.f32.mrf.mxu1 }
 0x5ea   : > { %v2565_v34 = vpop.f32.mrf.mxu0 }
 0x5eb   : > { %2676 = vrot.lane.b32.xlu1 %v2675_v32, %s2803_s16  ;;  %v1405_v35 = vpop.f32.mrf.mxu1 }
 0x5ec   : > { %v1453_v36 = vpop.f32.mrf.mxu0 }
 0x5ed   : > { %v2560_v15 = vpop.f32.mrf.mxu1 }
 0x5ee   : > { %v2566_v26 = vpop.f32.mrf.mxu0 }
 0x5ef   : > { %v2694_v26 = vld [vmem:[%s2906_s21 + $0x8] sm:$0xff]  }
 0x5f0   : > { %v1546_v20 = vpop.f32.mrf.mxu0  ;;  %2600 = vmatpush3.bf16.msra.mxu0 %v2694_v26 }
 0x5f1   : > { %2601 = vmatprep.subr.bf16.mxu0 %v2796_v48 }
 0x5f2   : > { %v2577_v37 = vpop.f32.mrf.mxu0 }
 0x5f4   : > { %v1549_v38 = vpop.f32.mrf.mxu0 }
 0x5f6   : > { %v2578_v39 = vpop.f32.mrf.mxu0 }
 0x616   : > { %v1642_v41 = vpop.f32.mrf.mxu0 }
 0x618   : > { %v2589_v43 = vpop.f32.mrf.mxu0 }
 0x619   : > { %v1776_v43 = vsub.s32 2, %v2998_v54 }
 0x61a   : > { %v1645_v44 = vpop.f32.mrf.mxu0 }
 0x61c   : > { %v1498_v45 = vpop.f32.mrf.mxu1  ;;  %v2590_v46 = vpop.f32.mrf.mxu0 }
 0x61d   : > { %v2680_v49 = vpack.i.bf16 %v1546_v20, %v1498_v45  ;;  %v1777_v46 = vrot.slane %v3002_v56, %v1776_v43 }
 0x61e   : > { %v2571_v52 = vpop.f32.mrf.mxu1 }
 0x61f   : > { %2681 = vrot.lane.b32.xlu0 %v2680_v49, %s2804_s20 }
 0x620   : > { %v1501_v57 = vpop.f32.mrf.mxu1 }
 0x622   : > { %v2572_v58 = vpop.f32.mrf.mxu1 }
 0x623   : > { %v1783_v58 = vrot.slane %v3002_v56, %v1782_v47 }
 0x624   : > { %v1594_v59 = vpop.f32.mrf.mxu1 }
 0x625   : > { %v2685_v60 = vpack.i.bf16 %v1642_v41, %v1594_v59 }
 0x626   : > { %v2583_v61 = vpop.f32.mrf.mxu1 }
 0x627   : > { %2686 = vrot.lane.b32.xlu1 %v2685_v60, %s2805_s29 }
 0x628   : > { %v1597_v62 = vpop.f32.mrf.mxu1 }
 0x62a   : > { %v2584_v63 = vpop.f32.mrf.mxu1 }
 0x62b   : > { %v2696_v63 = vld [vmem:[%s2911_s24 + $0x18] sm:$0xff]  }
 0x65d   : > { %v2677_v0 = vpop.permute.xlu1 %2676 }
 0x65e   : > { %v2679_v1 = vunpack.i.h.bf16 %v2677_v0  ;;  %v2678_v2 = vunpack.i.l.bf16 %v2677_v0  ;;  %v2697_v0 = vld [vmem:[%s2911_s24 + $0x10] sm:$0xff]  }
 0x660   : > { %v1673_v42 = vsel %vm705_vm3, %v1354_v22, %v2679_v1  ;;  %v1672_v53 = vsel %vm705_vm3, %v1306_v5, %v2678_v2  ;;  %v2699_v1 = vld [vmem:[%s2911_s24] sm:$0xff]   ;;  %v1793_v2 = vsub.s32 4, %v2998_v54 }
 0x691   : > { %v2682_v21 = vpop.permute.xlu0 %2681 }
 0x692   : > { %v2684_v3 = vunpack.i.h.bf16 %v2682_v21  ;;  %v2683_v7 = vunpack.i.l.bf16 %v2682_v21  ;;  %v2698_v21 = vld [vmem:[%s2911_s24 + $0x8] sm:$0xff]  }
 0x694   : > { %v1676_v10 = vsel %vm1674_vm5, %v1673_v42, %v2684_v3  ;;  %v1675_v11 = vsel %vm1674_vm5, %v1672_v53, %v2683_v7  ;;  %v1794_v3 = vrot.slane %v3002_v56, %v1793_v2 }
 0x699   : > { %v2687_v8 = vpop.permute.xlu1 %2686 }
 0x69a   : > { %v2689_v6 = vunpack.i.h.bf16 %v2687_v8  ;;  %v2688_v9 = vunpack.i.l.bf16 %v2687_v8 }
 0x69c   : > { %v1679_v12 = vsel %vm1677_vm6, %v1676_v10, %v2689_v6  ;;  %v1678_v13 = vsel %vm1677_vm6, %v1675_v11, %v2688_v9 }
 0x69d   : > { %v1680_v14 = vpack.c.bf16 %v1679_v12, %v1678_v13 }
 0x69f   : > { %2596 = vmatmul.mubr.msk.bf16.vlgmr.msra.gmra.mxu1 %vm629_vm2, %v1680_v14 }
 0x6a0   : > { %2615 = vmatprep.mubr.msk.bf16.mxu1 %vm2797_vm1, %v2796_v48  ;;  %2608 = vmatpush3.bf16.msra.mxu1 %v2696_v63 }
 0x6a1   : > { %2609 = vmatprep.subr.bf16.mxu1 %v2796_v48 }
 0x6a4   : > { %2610 = vmatpush3.bf16.msra.mxu1 %v2697_v0 }
 0x6a5   : > { %2611 = vmatprep.subr.bf16.mxu1 %v2796_v48 }
 0x6a8   : > { %2612 = vmatpush3.bf16.msra.mxu1 %v2698_v21 }
 0x6a9   : > { %2613 = vmatprep.subr.bf16.mxu1 %v2796_v48 }
 0x6ac   : > { %2614 = vmatpush3.bf16.msra.mxu1 %v2699_v1 }
 0x75f   : > { %v1738_v19 = vpop.f32.mrf.mxu1 }
 0x760   : > { %v1739_v16 = vadd.f32 %v1738_v19, %v1688_v18 }
 0x761   : > { %v2597_v4 = vpop.f32.mrf.mxu1 }
 0x762   : > { %v1745_v5 = vadd.f32 %v1739_v16, %v2985_v50 }
 0x763   : > { %v1741_v22 = vpop.f32.mrf.mxu1 }
 0x764   : > { %v1742_v23 = vadd.f32 %v1741_v22, %v1688_v18  ;;  %v1747_v24 = vsel %vm629_vm2, %v1745_v5, 0.0  ;;  %v1872_v22 = vsub.s32 5, %v2998_v54 }
 0x765   : > { %1748 = vadd.xlane.f32.xlu0 %v1747_v24  ;;  %v2598_v25 = vpop.f32.mrf.mxu1 }
 0x766   : > { %v1746_v27 = vadd.f32 %v1742_v23, %v2987_v51  ;;  %v2695_v51 = vld [vmem:[%s2906_s21] sm:$0xff]   ;;  %v1873_v23 = vrot.slane %v3002_v56, %v1872_v22 }
 0x767   : > { %2602 = vmatpush3.bf16.msra.mxu0 %v2695_v51 }
 0x768   : > { %v1750_v28 = vsel %vm629_vm2, %v1746_v27, 0.0 }
 0x769   : > { %1751 = vadd.xlane.f32.xlu1 %v1750_v28 }
 0x7ee   : > { %v1749_v29 = vpop.xlane.xlu0 %1748 }
 0x7ef   : > { %v1754_v30 = vmul.f32 0.03125, %v1749_v29 }
 0x7f1   : > { %v1756_v31 = vsub.f32 %v1745_v5, %v1754_v30 }
 0x7f2   : > { %v1752_v32 = vpop.xlane.xlu1 %1751 }
 0x7f3   : > { %v1755_v33 = vmul.f32 0.03125, %v1752_v32  ;;  %v1758_v34 = vmul.f32 %v1756_v31, %v1756_v31 }
 0x7f5   : > { %v1757_v50 = vsub.f32 %v1746_v27, %v1755_v33  ;;  %v1760_v35 = vsel %vm629_vm2, %v1758_v34, 0.0 }
 0x7f6   : > { %1761 = vadd.xlane.f32.xlu0 %v1760_v35 }
 0x7f7   : > { %v1759_v36 = vmul.f32 %v1757_v50, %v1757_v50 }
 0x7f9   : > { %v1763_v15 = vsel %vm629_vm2, %v1759_v36, 0.0 }
 0x7fa   : > { %1764 = vadd.xlane.f32.xlu0 %v1763_v15 }
 0x87f   : > { %v1762_v20 = vpop.xlane.xlu0 %1761 }
 0x880   : > { %v1766_v37 = vmul.f32 0.03125, %v1762_v20 }
 0x882   : > { %v1768_v38 = vadd.f32 1e-12, %v1766_v37 }
 0x883   : > { %v1765_v39 = vpop.xlane.xlu0 %1764 }
 0x884   : > { %2732 = vrsqrt.f32 %v1768_v38  ;;  %v1767_v40 = vmul.f32 0.03125, %v1765_v39 }
 0x886   : > { %v1769_v41 = vadd.f32 1e-12, %v1767_v40 }
 0x888   : > { %2734 = vrsqrt.f32 %v1769_v41 }
 0x891   : > { %v2733_v44 = vpop.eup %2732 }
 0x892   : > { %v1772_v45 = vmul.f32 %v2733_v44, %v1756_v31 }
 0x894   : > { %v1778_v57 = vmul.f32 %v1777_v46, %v1772_v45 }
 0x895   : > { %v2735_v49 = vpop.eup %2734 }
 0x896   : > { %v1773_v52 = vmul.f32 %v2735_v49, %v1757_v50  ;;  %v1784_v60 = vadd.f32 %v1783_v58, %v1778_v57  ;;  %v1979_v57 = vsub.s32 7, %v2998_v54 }
 0x898   : > { %v1779_v59 = vmul.f32 %v1777_v46, %v1773_v52  ;;  %v1973_v52 = vsub.s32 6, %v2998_v54 }
 0x89a   : > { %v1785_v61 = vadd.f32 %v1783_v58, %v1779_v59  ;;  %v1974_v58 = vrot.slane %v3002_v56, %v1973_v52 }
 0x89c   : > { %v1786_v62 = vpack.c.bf16 %v1785_v61, %v1784_v60 }
 0x89e   : > { %2604 = vmatmul.mubr.msk.bf16.vlgmr.msra.gmra.mxu0 %vm629_vm2, %v1786_v62 }
 0x95e   : > { %v1844_v7 = vpop.f32.mrf.mxu0 }
 0x95f   : > { %v1845_v8 = vadd.f32 %v1844_v7, %v1794_v3 }
 0x960   : > { %v2605_v42 = vpop.f32.mrf.mxu0 }
 0x961   : > { %v1853_v53 = vmul.f32 0.70710677, %v1845_v8  ;;  %v1851_v14 = vmul.f32 0.5, %v1845_v8 }
 0x962   : > { %v1847_v6 = vpop.f32.mrf.mxu0 }
 0x963   : > { %2736 = verf.f32 %v1853_v53  ;;  %v1848_v9 = vadd.f32 %v1847_v6, %v1794_v3 }
 0x964   : > { %v2606_v10 = vpop.f32.mrf.mxu0 }
 0x965   : > { %v1854_v11 = vmul.f32 0.70710677, %v1848_v9  ;;  %v1852_v18 = vmul.f32 0.5, %v1848_v9 }
 0x967   : > { %2738 = verf.f32 %v1854_v11 }
 0x970   : > { %v2737_v12 = vpop.eup %2736 }
 0x971   : > { %v1857_v48 = vadd.f32 1.0, %v2737_v12 }
 0x973   : > { %v1859_v16 = vmul.f32 %v1857_v48, %v1851_v14 }
 0x974   : > { %v2739_v13 = vpop.eup %2738 }
 0x975   : > { %v1858_v19 = vadd.f32 1.0, %v2739_v13 }
 0x977   : > { %v1860_v4 = vmul.f32 %v1858_v19, %v1852_v18 }
 0x979   : > { %v1861_v5 = vpack.c.bf16 %v1860_v4, %v1859_v16 }
 0x97b   : > { %2616 = vmatmul.mubr.msk.bf16.vlgmr.msra.gmra.mxu1 %vm1898_vm7, %v1861_v5 }
 0xa3b   : > { %v1936_v24 = vpop.f32.mrf.mxu1 }
 0xa3c   : > { %v1937_v25 = vadd.f32 %v1936_v24, %v1873_v23 }
 0xa3d   : > { %v2617_v27 = vpop.f32.mrf.mxu1 }
 0xa3e   : > { %v1943_v28 = vadd.f32 %v1937_v25, %v1784_v60  ;;  %v1980_v60 = vrot.slane %v3002_v56, %v1979_v57 }
 0xa3f   : > { %v1939_v29 = vpop.f32.mrf.mxu1 }
 0xa40   : > { %v1940_v30 = vadd.f32 %v1939_v29, %v1873_v23  ;;  %v1945_v31 = vsel %vm629_vm2, %v1943_v28, 0.0 }
 0xa41   : > { %1946 = vadd.xlane.f32.xlu1 %v1945_v31  ;;  %v2618_v32 = vpop.f32.mrf.mxu1 }
 0xa42   : > { %v1944_v33 = vadd.f32 %v1940_v30, %v1785_v61 }
 0xa44   : > { %v1948_v34 = vsel %vm629_vm2, %v1944_v33, 0.0 }
 0xa45   : > { %1949 = vadd.xlane.f32.xlu0 %v1948_v34 }
 0xaca   : > { %v1947_v50 = vpop.xlane.xlu1 %1946 }
 0xacb   : > { %v1951_v35 = vmul.f32 0.03125, %v1947_v50 }
 0xacd   : > { %v1953_v36 = vsub.f32 %v1943_v28, %v1951_v35 }
 0xace   : > { %v1950_v15 = vpop.xlane.xlu0 %1949 }
 0xacf   : > { %v1952_v26 = vmul.f32 0.03125, %v1950_v15  ;;  %v1955_v51 = vmul.f32 %v1953_v36, %v1953_v36 }
 0xad1   : > { %v1954_v20 = vsub.f32 %v1944_v33, %v1952_v26  ;;  %v1957_v37 = vsel %vm629_vm2, %v1955_v51, 0.0 }
 0xad2   : > { %1958 = vadd.xlane.f32.xlu1 %v1957_v37 }
 0xad3   : > { %v1956_v38 = vmul.f32 %v1954_v20, %v1954_v20 }
 0xad5   : > { %v1960_v39 = vsel %vm629_vm2, %v1956_v38, 0.0 }
 0xad6   : > { %1961 = vadd.xlane.f32.xlu0 %v1960_v39 }
 0xb5b   : > { %v1959_v40 = vpop.xlane.xlu1 %1958 }
 0xb5c   : > { %v1963_v41 = vmul.f32 0.03125, %v1959_v40 }
 0xb5e   : > { %v1965_v44 = vadd.f32 1e-12, %v1963_v41 }
 0xb5f   : > { %v1962_v45 = vpop.xlane.xlu0 %1961 }
 0xb60   : > { %2740 = vrsqrt.f32 %v1965_v44  ;;  %v1964_v46 = vmul.f32 0.03125, %v1962_v45 }
 0xb62   : > { %v1966_v49 = vadd.f32 1e-12, %v1964_v46 }
 0xb64   : > { %2742 = vrsqrt.f32 %v1966_v49 }
 0xb6d   : > { %v2741_v59 = vpop.eup %2740 }
 0xb6e   : > { %v1969_v61 = vmul.f32 %v2741_v59, %v1953_v36 }
 0xb70   : > { %v1975_v62 = vmul.f32 %v1974_v58, %v1969_v61 }
 0xb71   : > { %v2743_v63 = vpop.eup %2742 }
 0xb72   : > { %v1981_v0 = vadd.f32 %v1980_v60, %v1975_v62  ;;  %v1970_v21 = vmul.f32 %v2743_v63, %v1954_v20 }
 0xb74   : > { %1983 = vst.msk [vmem:[#allocation2] sm:$0xff] %vm629_vm2, %v1981_v0  ;;  %v1976_v1 = vmul.f32 %v1974_v58, %v1970_v21  ;;  %1987 = sbr.rel (%p2375_p5) target bundleno = 3155 (0xc53), region = 114 }
 0xb76   : > { %v1982_v3 = vadd.f32 %v1980_v60, %v1976_v1 }
 0xb78   : > { %1984 = vst.msk [vmem:[#allocation2 + $0x8] sm:$0xff] %vm629_vm2, %v1982_v3 }
 0xb79   : > { %2786 = dma.done.wait [#allocation4], 1280 }
 0xb7a   : > { %2787 = vsyncadd [#allocation4], 4294966016  ;;  %v1993_v7 = vpack.c.bf16 %v1982_v3, %v1982_v3  ;;  %v2806_v8 = vmov 0   ;;  %v1992_v56 = vpack.c.bf16 %v1981_v0, %v1981_v0  ;;  %v2744_v53 = vld [vmem:[#allocation3 + $0x2c] ss:$20 sps:$4 sm:$0xff]   ;;  %vm2038_vm8 = vcmask 1041409  }
 0xb7b   : > { %2128 = vmatprep.mubr.bf16.mxu0 %v2806_v8  ;;  %2169 = vmatprep.mubr.bf16.mxu1 %v2806_v8  ;;  %v2746_v10 = vld [vmem:[#allocation3 + $0x34] ss:$20 sps:$4 sm:$0xff]   ;;  %v2749_v12 = vld [vmem:[#allocation3 + $0x30] ss:$20 sps:$4 sm:$0xff]   ;;  %v2752_v13 = vld [vmem:[#allocation3 + $0xc] ss:$20 sps:$4 sm:$0xff]  }
 0xb7c   : > { %v2036_v42 = vunpack.c.l.b16 %v1993_v7  ;;  %v2035_v6 = vunpack.c.l.b16 %v1992_v56  ;;  %2108 = vmatprep.subr.bf16.mxu0 %v2744_v53  ;;  %v2748_v11 = vld [vmem:[#allocation3 + $0x28] ss:$20 sps:$4 sm:$0xff]   ;;  %2149 = vmatprep.subr.bf16.mxu1 %v2746_v10  ;;  %v2750_v48 = vld [vmem:[#allocation3 + $0x4] ss:$20 sps:$4 sm:$0xff]   ;;  %v2754_v14 = vld [vmem:[#allocation3] ss:$20 sps:$4 sm:$0xff]  }
 0xb7d   : > { %2109 = vmatpush1.bf16.msra.mxu0 %v2748_v11  ;;  %2150 = vmatpush1.bf16.msra.mxu1 %v2749_v12  ;;  %v2755_v19 = vld [vmem:[#allocation3 + $0x8] ss:$20 sps:$4 sm:$0xff]   ;;  %v2756_v4 = vld [vmem:[#allocation3 + $0x38] ss:$20 sps:$4 sm:$0xff]   ;;  %v2807_v5 = vmov 0.0   ;;  %vm2808_vm9 = vmmov 0  }
 0xb7e   : > { %v2037_v9 = vrot.slane %v2036_v42, 7  ;;  %2110 = vmatprep.subr.bf16.mxu0 %v2750_v48  ;;  %2151 = vmatprep.subr.bf16.mxu1 %v2752_v13  ;;  %v2757_v22 = vld [vmem:[#allocation3 + $0x10] ss:$20 sps:$4 sm:$0xff]   ;;  %v2809_v23 = vmov 1983009808  }
 0xb7f   : > { %v2226_v24 = vunpack.c.l.s4 %v2809_v23  ;;  %v2006_v25 = vld [vmem:[%s3313_s12] sm:$0x1f] }
 0xb80   : > { %v2039_v18 = vsel %vm2038_vm8, %v2037_v9, %v2035_v6  ;;  %v2019_v27 = vrot.slane %v2006_v25, %v1776_v43  ;;  %v2011_v28 = vrot.slane %v2006_v25, %v615_v55  ;;  %v2015_v29 = vrot.slane %v2006_v25, %v1687_v17 }
 0xb81   : > { %v2040_v16 = vpack.c.b16 %v2039_v18, %v2039_v18  ;;  %2111 = vmatpush1.bf16.msra.mxu0 %v2754_v14  ;;  %2152 = vmatpush1.bf16.msra.mxu1 %v2755_v19  ;;  %v2227_v30 = vunpack.c.0.s8 %v2226_v24  ;;  %v2023_v31 = vrot.slane %v2006_v25, %v1782_v47  ;;  %v2027_v17 = vrot.slane %v2006_v25, %v1793_v2 }
 0xb82   : > { %2619 = vmatprep.subr.bf16.mxu0 %v2807_v5 }
 0xb83   : > { %v2230_v26 = vsub.s32 %v2227_v30, %v2998_v54 }
 0xb84   : > { %2425 = vmatmul.mubr.msk.bf16.vlgmr.msra.gmra.mxu0 %vm629_vm2, %v2040_v16  ;;  %2426 = vmatmul.mubr.msk.bf16.vlgmr.msra.gmra.mxu1 %vm629_vm2, %v2040_v16 }
 0xb85   : > { %2620 = vmatpush3.bf16.msra.mxu0 %v2756_v4  ;;  %2623 = vmatprep.mubr.msk.bf16.mxu0 %vm2808_vm9, %v2807_v5 }
 0xb86   : > { %2621 = vmatprep.subr.bf16.mxu0 %v2807_v5 }
 0xb89   : > { %2622 = vmatpush3.bf16.msra.mxu0 %v2757_v22 }
 0xb8c   : > { %2624 = vmatmul.mubr.msk.bf16.vlgmr.msra.gmra.mxu0 %vm629_vm2, %v2040_v16 }
 0xc44   : > { %v2130_v32 = vpop.f32.mrf.mxu0  ;;  %v2171_v33 = vpop.f32.mrf.mxu1 }
 0xc45   : > { %v2172_v34 = vadd.f32 %v2171_v33, %v2019_v27  ;;  %v2131_v36 = vadd.f32 %v2130_v32, %v2011_v28 }
 0xc46   : > { %v2132_v50 = vpop.f32.mrf.mxu0  ;;  %v2173_v35 = vpop.f32.mrf.mxu1 }
 0xc47   : > { %v2133_v15 = vadd.f32 %v2132_v50, %v2015_v29  ;;  %v2174_v43 = vadd.f32 %v2173_v35, %v2023_v31 }
 0xc48   : > { %v2134_v51 = vpop.f32.mrf.mxu0  ;;  %v2175_v20 = vpop.f32.mrf.mxu1 }
 0xc49   : > { %v2223_v55 = vcombine.low %v2131_v36, %v2133_v15  ;;  %v2224_v37 = vcombine.low %v2172_v34, %v2174_v43 }
 0xc4a   : > { %v2135_v38 = vpop.f32.mrf.mxu0  ;;  %v2176_v39 = vpop.f32.mrf.mxu1 }
 0xc4b   : > { %v2231_v47 = vrot.slane %v2223_v55, %v2230_v26  ;;  %v2238_v40 = vrot.slane %v2224_v37, %v2230_v26 }
 0xc4c   : > { %v2212_v41 = vpop.f32.mrf.mxu0 }
 0xc4d   : > { %v2239_v44 = vcombine.low %v2231_v47, %v2238_v40  ;;  %v2213_v45 = vadd.f32 %v2212_v41, %v2027_v17 }
 0xc4e   : > { %v2625_v46 = vpop.f32.mrf.mxu0 }
 0xc4f   : > { %2249 = vst [vmem:[#allocation5] sm:$0xff] %v2239_v44  ;;  %2428 = vst.sshfl [vmem:[#allocation5 + $0x8] sm:$0x3 pattern:$0x76325410] %v2213_v45 }
 0xc50   : > { %v2215_v49 = vpop.f32.mrf.mxu0 }
 0xc52   : > { %v2626_v52 = vpop.f32.mrf.mxu0 }
 0xc53 PF: > { %p2631_p6 = scmp.eq.s32.totalorder %s2887_s26, 1  ;;  %s2810_s24 = smov [#allocation5]  }
 0xc54   : > { %s2258_s27 = sshll.u32 %s2810_s24, 4  ;;  %s2259_s27 = int_to_ptr.vmem [resolvable:$true] %s2258_s27 }
 0xc55   : > { %s2758_s13 = scalar_lea.vmem %s2259_s27, 160  ;;  %p2765_p10 = scmp.lt.s32.totalorder %s2259_s27, %s2259_s27 }
 0xc56   : > { %p2759_p7 = scmp.ne.s32.totalorder %s2259_s27, %s2758_s13  ;;  %p2766_p11 = scmp.lt.s32.totalorder %s2758_s13, %s2758_s13 }
 0xc58   : > { %p2760_p8 = pnand %p2759_p7, %p2631_p6  ;;  %p2767_p12 = por %p2766_p11, %p2765_p10 }
 0xc5a   : > { %p2761_p9 = pneg %p2760_p8 }
 0xc5c   : > { %p2768_p13 = pnand %p2767_p12, %p2761_p9 }
 0xc5e   : > { %2771 = shalt.err (!%p2768_p13)
}
 0xc5f   : > { %s3318_s15 = sld [smem:[#allocation11_spill]] }
 0xc65   : > { %2628 = dma.vmem_to_hbm [thread:$0]  (%p2631_p6), %s2259_s27, 160, %s3318_s15, [#allocation6]  }
 0xc66   : > { %2789 = dma.done.wait (%p2631_p6), [#allocation6], 160  }
 0xc67   : > { %2791 = vsyncadd (%p2631_p6), [#allocation6], 4294967136 }
 0xc68 PF: > { %s3319_s23 = sld [smem:[#allocation10_spill]] }
 0xc6e   : > { %s24_s25 = sadd.s32 1, %s3319_s23  }
 0xc6f   : > { %p21_p0 = scmp.ge.s32.totalorder %s24_s25, 4  }
 0xc71   :  { %23 = sbr.rel (!%p21_p0) target bundleno = 3 (0x3), region = 161 }
 0xc76   :  { %2271 = vsyncpa [#allocation6], 1 }
 0xc77   :  { %2273 = vsyncpa [#allocation6 + $0x1], 1 }
 0xc78   :  { %2274 = vsyncmov [#allocation4] }
 0xc7b   :  { %s2275_s30 = vpop.sfrf %2274 }
 0xc7c   :  { %p2433_p1 = scmp.ne.s32.totalorder %s2275_s30, 0 }
 0xc7e   :  { %2279 = shalt.err (%p2433_p1)  }

</bundles_post_ra>
